<compile_context>
chip_gen: v5e
topology: v5e:2x2
jax: 0.10.0
libtpu: 0.0.40
codegen_flags: <defaults>
</compile_context>

<pallas_src>
import jax
import jax.numpy as jnp
from jax.experimental import pallas as pl
from jax.experimental.pallas import tpu as pltpu

Z_DIM = 50                      # split of the 60-dim input: z=50, c=10
C_DIM = 10
IN_DIM = Z_DIM + C_DIM          # 60
IN_PAD = 64                     # pad 60 -> 64 so layer 1 is one aligned K=64 dot
H1, H2, H3, OUT = 128, 384, 512, 784


def _round_up(x, m):
    return ((x + m - 1) // m) * m


def _generator_kernel(x_ref,
                      w1_ref, b1_ref,
                      w2_ref, b2_ref,
                      w3_ref, b3_ref,
                      w4_ref, b4_ref,
                      o_ref):
    """Fused 4-layer MLP on one (TM, 64) batch tile.

    Matmul inputs are bf16, accumulation is f32 (preferred_element_type);
    bias add / ReLU stay f32; the final (TM, 784) tile is stored directly.
    """
    h = jnp.dot(x_ref[...], w1_ref[...],
                preferred_element_type=jnp.float32) + b1_ref[...]
    h = jnp.maximum(h, 0.0)

    h = jnp.dot(h.astype(jnp.bfloat16), w2_ref[...],
                preferred_element_type=jnp.float32) + b2_ref[...]
    h = jnp.maximum(h, 0.0)

    h = jnp.dot(h.astype(jnp.bfloat16), w3_ref[...],
                preferred_element_type=jnp.float32) + b3_ref[...]
    h = jnp.maximum(h, 0.0)

    o_ref[...] = (jnp.dot(h.astype(jnp.bfloat16), w4_ref[...],
                          preferred_element_type=jnp.float32)
                  + b4_ref[...]).astype(o_ref.dtype)


def prepare_params(params):
    """One-time weight preprocessing (hoisted out of the per-call path).

    Pads w1's K dim 60 -> 64 with zero rows so the concat-free layer-1 dot is
    a single aligned K=64 matmul. Everything else is passed through.
    """
    (w1, b1), (w2, b2), (w3, b3), (w4, b4) = params
    w1p = jnp.pad(w1, ((0, IN_PAD - IN_DIM), (0, 0)))      # (64, 128) bf16
    return (w1p, b1, w2, b2, w3, b3, w4, b4)


def _choose_tile(batch, tm_max):
    """Batch tile: multiple of 16 (bf16 tiling), capped at tm_max, and capped
    so the grid has >= 2 steps for non-trivial batches (v7x dual-TC)."""
    b16 = _round_up(max(batch, 1), 16)
    tm = min(tm_max, b16)
    if b16 > 16:
        tm = min(tm, _round_up((b16 + 1) // 2, 16))
    b_pad = _round_up(batch, tm)
    return tm, b_pad


def generator_forward(z, c, prepared, *, tm_max=1024):
    """z: (B, 50), c: (B, 10) -> (B, 784) float32."""
    B = z.shape[0]
    tm, b_pad = _choose_tile(B, tm_max)
    grid = (b_pad // tm,)

    w1p, b1, w2, b2, w3, b3, w4, b4 = prepared

    # torch.cat([z, c], 1) in bf16, zero-padded to (b_pad, 64). This is the
    # only per-call preprocessing; it is ~128 B/row vs ~3.1 KB/row of output.
    x = jnp.concatenate([z, c], axis=1).astype(jnp.bfloat16)
    x = jnp.pad(x, ((0, b_pad - B), (0, IN_PAD - IN_DIM)))

    def resident(a):
        # Full array, constant block index -> stays VMEM-resident across steps.
        return pl.BlockSpec(a.shape, lambda i: (0,) * a.ndim)

    in_specs = [
        pl.BlockSpec((tm, IN_PAD), lambda i: (i, 0)),       # x tile
        resident(w1p), resident(b1),
        resident(w2), resident(b2),
        resident(w3), resident(b3),
        resident(w4), resident(b4),
    ]
    out_spec = pl.BlockSpec((tm, OUT), lambda i: (i, 0))

    weight_bytes = sum(int(a.size) * a.dtype.itemsize
                       for a in (w1p, b1, w2, b2, w3, b3, w4, b4))
    cost = pl.CostEstimate(
        flops=2 * b_pad * (IN_PAD * H1 + H1 * H2 + H2 * H3 + H3 * OUT),
        transcendentals=0,
        bytes_accessed=b_pad * IN_PAD * 2 + b_pad * OUT * 4 + weight_bytes,
    )

    out = pl.pallas_call(
        _generator_kernel,
        out_shape=jax.ShapeDtypeStruct((b_pad, OUT), jnp.float32),
        grid=grid,
        in_specs=in_specs,
        out_specs=out_spec,
        compiler_params=pltpu.CompilerParams(
            dimension_semantics=("parallel",),
            vmem_limit_bytes=48 * 1024 * 1024,
        ),
        cost_estimate=cost,
    )(x, w1p, b1, w2, b2, w3, b3, w4, b4)

    # Only a (cheap) row slice remains, and only when the batch was padded.
    return out if b_pad == B else out[:B]


def init_params(key):
    """PyTorch-Linear-style init U(-1/sqrt(fan_in), +1/sqrt(fan_in)).

    Weights stored transposed as (in_features, out_features) in bf16 (MXU
    native); biases stored as (1, out_features) in f32.
    """
    dims = [(IN_DIM, H1), (H1, H2), (H2, H3), (H3, OUT)]
    params = []
    for i, (fan_in, fan_out) in enumerate(dims):
        kw, kb = jax.random.split(jax.random.fold_in(key, i))
        bound = 1.0 / jnp.sqrt(jnp.float32(fan_in))
        w = jax.random.uniform(kw, (fan_in, fan_out), jnp.float32, -bound, bound)
        b = jax.random.uniform(kb, (1, fan_out), jnp.float32, -bound, bound)
        params.append((w.astype(jnp.bfloat16), b))
    return tuple(params)


def _reference_forward(z, c, params):
    """Pure-JAX reference with the same numerics as the kernel:
    bf16 matmul inputs, f32 accumulation / bias add / ReLU."""
    x = jnp.concatenate([z, c], axis=1).astype(jnp.bfloat16)
    for i, (w, b) in enumerate(params):
        x = jnp.dot(x, w, preferred_element_type=jnp.float32) + b
        if i < 3:
            x = jnp.maximum(x, 0.0).astype(jnp.bfloat16)
    return x


if __name__ == "__main__":
    key = jax.random.PRNGKey(0)
    kz, kc, kp = jax.random.split(key, 3)

    B = 2
    z = jax.random.normal(kz, (B, Z_DIM), jnp.float32)
    c = jax.random.normal(kc, (B, C_DIM), jnp.float32)
    params = init_params(kp)
    prepared = prepare_params(params)

    out = generator_forward(z, c, prepared)
    out = jax.block_until_ready(out)

    ref = _reference_forward(z, c, params)
    assert out.shape == (B, OUT), out.shape
    max_err = float(jnp.max(jnp.abs(out - ref)))
    assert jnp.allclose(out, ref, atol=3e-2, rtol=3e-2), (
        f"mismatch vs reference: max abs err = {max_err}")

    print("KERNEL_OK")
</pallas_src>

<mosaic_0001>
module attributes {stable_mosaic.version = 11 : i64} {
  func.func @_generator_kernel(%arg0: i32, %arg1: memref<16x64xbf16, #tpu.memory_space<vmem>>, %arg2: memref<64x128xbf16, #tpu.memory_space<vmem>>, %arg3: memref<1x128xf32, #tpu.memory_space<vmem>>, %arg4: memref<128x384xbf16, #tpu.memory_space<vmem>>, %arg5: memref<1x384xf32, #tpu.memory_space<vmem>>, %arg6: memref<384x512xbf16, #tpu.memory_space<vmem>>, %arg7: memref<1x512xf32, #tpu.memory_space<vmem>>, %arg8: memref<512x784xbf16, #tpu.memory_space<vmem>>, %arg9: memref<1x784xf32, #tpu.memory_space<vmem>>, %arg10: memref<16x784xf32, #tpu.memory_space<vmem>>) attributes {dimension_semantics = [#tpu.dimension_semantics<parallel>], iteration_bounds = array<i64: 1>, scalar_prefetch = 0 : i64, scratch_operands = 0 : i64, tpu.core_type = #tpu.core_type<tc>, window_params = [{transform_indices = @transform_0, window_bounds = array<i64: 16, 64>}, {pipeline_mode = #tpu.pipeline_mode<synchronous>, transform_indices = @transform_1, window_bounds = array<i64: 64, 128>}, {pipeline_mode = #tpu.pipeline_mode<synchronous>, transform_indices = @transform_2, window_bounds = array<i64: 1, 128>}, {pipeline_mode = #tpu.pipeline_mode<synchronous>, transform_indices = @transform_3, window_bounds = array<i64: 128, 384>}, {pipeline_mode = #tpu.pipeline_mode<synchronous>, transform_indices = @transform_4, window_bounds = array<i64: 1, 384>}, {pipeline_mode = #tpu.pipeline_mode<synchronous>, transform_indices = @transform_5, window_bounds = array<i64: 384, 512>}, {pipeline_mode = #tpu.pipeline_mode<synchronous>, transform_indices = @transform_6, window_bounds = array<i64: 1, 512>}, {pipeline_mode = #tpu.pipeline_mode<synchronous>, transform_indices = @transform_7, window_bounds = array<i64: 512, 784>}, {pipeline_mode = #tpu.pipeline_mode<synchronous>, transform_indices = @transform_8, window_bounds = array<i64: 1, 784>}, {transform_indices = @transform_9, window_bounds = array<i64: 16, 784>}]} {
    %c0 = arith.constant 0 : index
    %c0_0 = arith.constant 0 : index
    %0 = vector.load %arg1[%c0, %c0_0] : memref<16x64xbf16, #tpu.memory_space<vmem>>, vector<16x64xbf16>
    %c0_1 = arith.constant 0 : index
    %c0_2 = arith.constant 0 : index
    %1 = vector.load %arg2[%c0_1, %c0_2] : memref<64x128xbf16, #tpu.memory_space<vmem>>, vector<64x128xbf16>
    %cst = arith.constant dense<0.000000e+00> : vector<16x128xf32>
    %2 = tpu.matmul %0, %1, %cst {dimension_numbers = #tpu.dot_dimension_numbers<[1], [0], [0], [1], [0, 0, 1, 1], [], []>} : vector<16x64xbf16>, vector<64x128xbf16>, vector<16x128xf32> -> vector<16x128xf32>
    %c0_3 = arith.constant 0 : index
    %c0_4 = arith.constant 0 : index
    %3 = vector.load %arg3[%c0_3, %c0_4] : memref<1x128xf32, #tpu.memory_space<vmem>>, vector<1x128xf32>
    %4 = vector.broadcast %3 : vector<1x128xf32> to vector<16x128xf32>
    %5 = arith.addf %2, %4 : vector<16x128xf32>
    %cst_5 = arith.constant 0.000000e+00 : f32
    %6 = vector.broadcast %cst_5 : f32 to vector<16x128xf32>
    %7 = arith.maximumf %5, %6 : vector<16x128xf32>
    %8 = arith.truncf %7 : vector<16x128xf32> to vector<16x128xbf16>
    %c0_6 = arith.constant 0 : index
    %c0_7 = arith.constant 0 : index
    %9 = vector.load %arg4[%c0_6, %c0_7] : memref<128x384xbf16, #tpu.memory_space<vmem>>, vector<128x384xbf16>
    %cst_8 = arith.constant dense<0.000000e+00> : vector<16x384xf32>
    %10 = tpu.matmul %8, %9, %cst_8 {dimension_numbers = #tpu.dot_dimension_numbers<[1], [0], [0], [1], [0, 0, 1, 1], [], []>} : vector<16x128xbf16>, vector<128x384xbf16>, vector<16x384xf32> -> vector<16x384xf32>
    %c0_9 = arith.constant 0 : index
    %c0_10 = arith.constant 0 : index
    %11 = vector.load %arg5[%c0_9, %c0_10] : memref<1x384xf32, #tpu.memory_space<vmem>>, vector<1x384xf32>
    %12 = vector.broadcast %11 : vector<1x384xf32> to vector<16x384xf32>
    %13 = arith.addf %10, %12 : vector<16x384xf32>
    %cst_11 = arith.constant 0.000000e+00 : f32
    %14 = vector.broadcast %cst_11 : f32 to vector<16x384xf32>
    %15 = arith.maximumf %13, %14 : vector<16x384xf32>
    %16 = arith.truncf %15 : vector<16x384xf32> to vector<16x384xbf16>
    %c0_12 = arith.constant 0 : index
    %c0_13 = arith.constant 0 : index
    %17 = vector.load %arg6[%c0_12, %c0_13] : memref<384x512xbf16, #tpu.memory_space<vmem>>, vector<384x512xbf16>
    %cst_14 = arith.constant dense<0.000000e+00> : vector<16x512xf32>
    %18 = tpu.matmul %16, %17, %cst_14 {dimension_numbers = #tpu.dot_dimension_numbers<[1], [0], [0], [1], [0, 0, 1, 1], [], []>} : vector<16x384xbf16>, vector<384x512xbf16>, vector<16x512xf32> -> vector<16x512xf32>
    %c0_15 = arith.constant 0 : index
    %c0_16 = arith.constant 0 : index
    %19 = vector.load %arg7[%c0_15, %c0_16] : memref<1x512xf32, #tpu.memory_space<vmem>>, vector<1x512xf32>
    %20 = vector.broadcast %19 : vector<1x512xf32> to vector<16x512xf32>
    %21 = arith.addf %18, %20 : vector<16x512xf32>
    %cst_17 = arith.constant 0.000000e+00 : f32
    %22 = vector.broadcast %cst_17 : f32 to vector<16x512xf32>
    %23 = arith.maximumf %21, %22 : vector<16x512xf32>
    %24 = arith.truncf %23 : vector<16x512xf32> to vector<16x512xbf16>
    %c0_18 = arith.constant 0 : index
    %c0_19 = arith.constant 0 : index
    %25 = vector.load %arg8[%c0_18, %c0_19] : memref<512x784xbf16, #tpu.memory_space<vmem>>, vector<512x784xbf16>
    %cst_20 = arith.constant dense<0.000000e+00> : vector<16x784xf32>
    %26 = tpu.matmul %24, %25, %cst_20 {dimension_numbers = #tpu.dot_dimension_numbers<[1], [0], [0], [1], [0, 0, 1, 1], [], []>} : vector<16x512xbf16>, vector<512x784xbf16>, vector<16x784xf32> -> vector<16x784xf32>
    %c0_21 = arith.constant 0 : index
    %c0_22 = arith.constant 0 : index
    %27 = vector.load %arg9[%c0_21, %c0_22] : memref<1x784xf32, #tpu.memory_space<vmem>>, vector<1x784xf32>
    %28 = vector.broadcast %27 : vector<1x784xf32> to vector<16x784xf32>
    %29 = arith.addf %26, %28 : vector<16x784xf32>
    %c0_23 = arith.constant 0 : index
    %c0_24 = arith.constant 0 : index
    %30 = vector.load %arg10[%c0_23, %c0_24] : memref<16x784xf32, #tpu.memory_space<vmem>>, vector<16x784xf32>
    tpu.vector_store %arg10[%c0_23, %c0_24], %29 {strides = array<i32>} : memref<16x784xf32, #tpu.memory_space<vmem>>, vector<16x784xf32>,
    return
  }
  func.func @transform_0(%arg0: i32) -> (i32, i32) {
    %c0_i32 = arith.constant 0 : i32
    %c0_i32_0 = arith.constant 0 : i32
    return %arg0, %c0_i32 : i32, i32
  }
  func.func @transform_1(%arg0: i32) -> (i32, i32) {
    %c0_i32 = arith.constant 0 : i32
    %c0_i32_0 = arith.constant 0 : i32
    %c0_i32_1 = arith.constant 0 : i32
    return %c0_i32, %c0_i32_0 : i32, i32
  }
  func.func @transform_2(%arg0: i32) -> (i32, i32) {
    %c0_i32 = arith.constant 0 : i32
    %c0_i32_0 = arith.constant 0 : i32
    %c0_i32_1 = arith.constant 0 : i32
    return %c0_i32, %c0_i32_0 : i32, i32
  }
  func.func @transform_3(%arg0: i32) -> (i32, i32) {
    %c0_i32 = arith.constant 0 : i32
    %c0_i32_0 = arith.constant 0 : i32
    %c0_i32_1 = arith.constant 0 : i32
    return %c0_i32, %c0_i32_0 : i32, i32
  }
  func.func @transform_4(%arg0: i32) -> (i32, i32) {
    %c0_i32 = arith.constant 0 : i32
    %c0_i32_0 = arith.constant 0 : i32
    %c0_i32_1 = arith.constant 0 : i32
    return %c0_i32, %c0_i32_0 : i32, i32
  }
  func.func @transform_5(%arg0: i32) -> (i32, i32) {
    %c0_i32 = arith.constant 0 : i32
    %c0_i32_0 = arith.constant 0 : i32
    %c0_i32_1 = arith.constant 0 : i32
    return %c0_i32, %c0_i32_0 : i32, i32
  }
  func.func @transform_6(%arg0: i32) -> (i32, i32) {
    %c0_i32 = arith.constant 0 : i32
    %c0_i32_0 = arith.constant 0 : i32
    %c0_i32_1 = arith.constant 0 : i32
    return %c0_i32, %c0_i32_0 : i32, i32
  }
  func.func @transform_7(%arg0: i32) -> (i32, i32) {
    %c0_i32 = arith.constant 0 : i32
    %c0_i32_0 = arith.constant 0 : i32
    %c0_i32_1 = arith.constant 0 : i32
    return %c0_i32, %c0_i32_0 : i32, i32
  }
  func.func @transform_8(%arg0: i32) -> (i32, i32) {
    %c0_i32 = arith.constant 0 : i32
    %c0_i32_0 = arith.constant 0 : i32
    %c0_i32_1 = arith.constant 0 : i32
    return %c0_i32, %c0_i32_0 : i32, i32
  }
  func.func @transform_9(%arg0: i32) -> (i32, i32) {
    %c0_i32 = arith.constant 0 : i32
    %c0_i32_0 = arith.constant 0 : i32
    return %arg0, %c0_i32 : i32, i32
  }
}

</mosaic_0001>

<bundles_post_ra>
// kernel: tpu_custom_call.1
= control target key start
LH: loop header
LB: loop body
LE: loop exit
PB: predicated region body
PF: predicated region fallthrough
CT: control target
= control target key end

     0   :  { %s6924_s0 = inlined_call_operand.vmem [shape: bf16[16,64], index: 0, kind: input, shape index: {}]   ;;  %s6925_s1 = inlined_call_operand.vmem [shape: bf16[64,128], index: 1, kind: input, shape index: {}]   ;;  %s6926_s2 = inlined_call_operand.vmem [shape: f32[1,128], index: 2, kind: input, shape index: {}]   ;;  %s6927_s3 = inlined_call_operand.vmem [shape: bf16[128,384], index: 3, kind: input, shape index: {}]   ;;  %s6928_s4 = inlined_call_operand.vmem [shape: f32[1,384], index: 4, kind: input, shape index: {}]   ;;  %s6929_s5 = inlined_call_operand.vmem [shape: bf16[384,512], index: 5, kind: input, shape index: {}]   ;;  %s6930_s6 = inlined_call_operand.vmem [shape: f32[1,512], index: 6, kind: input, shape index: {}]   ;;  %s6931_s7 = inlined_call_operand.vmem [shape: bf16[512,784], index: 7, kind: input, shape index: {}]   ;;  %s6932_s8 = inlined_call_operand.vmem [shape: f32[1,784], index: 8, kind: input, shape index: {}]   ;;  %s6933_s9 = inlined_call_operand.hbm [shape: f32[16,784], index: 9, kind: output, shape index: {}]  }
   0x1   :  { %v4333_v0 = vld [vmem:[%s6925_s1 + $0x18] sm:$0xff]  ;;  %v4332_v1 = vld [vmem:[%s6925_s1 + $0x10] sm:$0xff]  ;;  %v3039_v2 = vld [vmem:[%s6927_s3 + $0xa8] sm:$0xf] }
   0x2   :  { %85 = vmatpush.bf16.msra.mxu0 %v4333_v0  ;;  %v4356_v3 = vld [vmem:[%s6927_s3 + $0xb0] sm:$0xf0]  ;;  %v4355_v4 = vld [vmem:[%s6927_s3 + $0xac] sm:$0xf]  ;;  %v3041_v5 = vld [vmem:[%s6927_s3 + $0xb4] sm:$0xf0] }
   0x3   :  { %v3040_v6 = vor.u32 %v4356_v3, %v3039_v2  ;;  %v3044_v7 = vor.u32 %v4355_v4, %v3041_v5  ;;  %v3047_v8 = vld [vmem:[%s6927_s3 + $0xb0] sm:$0xf]  ;;  %v4357_v9 = vld [vmem:[%s6927_s3 + $0xb8] sm:$0xf0]  ;;  %v4331_v11 = vld [vmem:[%s6925_s1 + $0x8] sm:$0xff] }
   0x4   :  { %v3027_v10 = vld [vmem:[%s6927_s3 + $0x90] sm:$0xf]  ;;  %v3048_v12 = vor.u32 %v4357_v9, %v3047_v8  ;;  %v4353_v13 = vld [vmem:[%s6927_s3 + $0x98] sm:$0xf0]  ;;  %v4352_v14 = vld [vmem:[%s6927_s3 + $0x94] sm:$0xf] }
   0x5   :  { %v3029_v15 = vld [vmem:[%s6927_s3 + $0x9c] sm:$0xf0]  ;;  %266 = vmatpush.bf16.msra.mxu1 %v3040_v6  ;;  %280 = vmatpush.bf16.msra.mxu2 %v3044_v7  ;;  %v3028_v16 = vor.u32 %v4353_v13, %v3027_v10  ;;  %v3035_v18 = vld [vmem:[%s6927_s3 + $0x98] sm:$0xf]  ;;  %v4354_v19 = vld [vmem:[%s6927_s3 + $0xa0] sm:$0xf0] }
   0x6   :  { %v3032_v17 = vor.u32 %v4352_v14, %v3029_v15  ;;  %v3015_v20 = vld [vmem:[%s6927_s3 + $0x78] sm:$0xf]  ;;  %86 = vmatpush.bf16.msra.mxu0 %v4332_v1  ;;  %294 = vmatpush.bf16.msra.mxu3 %v3048_v12  ;;  %v3036_v21 = vor.u32 %v4354_v19, %v3035_v18  ;;  %v4350_v22 = vld [vmem:[%s6927_s3 + $0x80] sm:$0xf0]  ;;  %v4349_v23 = vld [vmem:[%s6927_s3 + $0x7c] sm:$0xf] }
   0x7   :  { %v3017_v24 = vld [vmem:[%s6927_s3 + $0x84] sm:$0xf0]  ;;  %v3023_v25 = vld [vmem:[%s6927_s3 + $0x80] sm:$0xf]  ;;  %v4351_v26 = vld [vmem:[%s6927_s3 + $0x88] sm:$0xf0]  ;;  %v3016_v28 = vor.u32 %v4350_v22, %v3015_v20 }
   0x8   :  { %v4330_v27 = vld [vmem:[%s6925_s1] sm:$0xff]  ;;  %v3020_v29 = vor.u32 %v4349_v23, %v3017_v24  ;;  %v3024_v31 = vor.u32 %v4351_v26, %v3023_v25  ;;  %v4347_v32 = vld [vmem:[%s6927_s3 + $0x68] sm:$0xf0] }
   0x9   :  { %267 = vmatpush.bf16.msra.mxu1 %v3028_v16  ;;  %281 = vmatpush.bf16.msra.mxu2 %v3032_v17  ;;  %v3003_v30 = vld [vmem:[%s6927_s3 + $0x60] sm:$0xf]  ;;  %v4346_v33 = vld [vmem:[%s6927_s3 + $0x64] sm:$0xf] }
   0xa   :  { %87 = vmatpush.bf16.msra.mxu0 %v4331_v11  ;;  %295 = vmatpush.bf16.msra.mxu3 %v3036_v21 }
   0xb   :  { %14 = vsyncpa [#allocation3], 0  ;;  %v3005_v34 = vld [vmem:[%s6927_s3 + $0x6c] sm:$0xf0]  ;;  %v3011_v35 = vld [vmem:[%s6927_s3 + $0x68] sm:$0xf]  ;;  %v3004_v38 = vor.u32 %v4347_v32, %v3003_v30 }
   0xc   :  { %v4348_v36 = vld [vmem:[%s6927_s3 + $0x70] sm:$0xf0]  ;;  %v4329_v37 = vld [vmem:[%s6924_s0] sm:$0xff]  ;;  %vm77_vm0 = vcmask 523264   ;;  %v3008_v39 = vor.u32 %v4346_v33, %v3005_v34  ;;  %v2991_v41 = vld [vmem:[%s6927_s3 + $0x48] sm:$0xf] }
   0xd   :  { %268 = vmatpush.bf16.msra.mxu1 %v3016_v28  ;;  %282 = vmatpush.bf16.msra.mxu2 %v3020_v29  ;;  %v3012_v40 = vor.u32 %v4348_v36, %v3011_v35  ;;  %v4344_v42 = vld [vmem:[%s6927_s3 + $0x50] sm:$0xf0]  ;;  %v4343_v43 = vld [vmem:[%s6927_s3 + $0x4c] sm:$0xf]  ;;  %v2993_v45 = vld [vmem:[%s6927_s3 + $0x54] sm:$0xf0] }
   0xe   :  { %88 = vmatpush.bf16.msra.mxu0 %v4330_v27  ;;  %296 = vmatpush.bf16.msra.mxu3 %v3024_v31  ;;  %v2992_v44 = vor.u32 %v4344_v42, %v2991_v41  ;;  %v2999_v46 = vld [vmem:[%s6927_s3 + $0x50] sm:$0xf]  ;;  %v4345_v47 = vld [vmem:[%s6927_s3 + $0x58] sm:$0xf0]  ;;  %v2996_v48 = vor.u32 %v4343_v43, %v2993_v45  ;;  %v4340_v52 = vld [vmem:[%s6927_s3 + $0x34] sm:$0xf] }
   0xf   :  { %v3000_v49 = vor.u32 %v4345_v47, %v2999_v46  ;;  %v2979_v50 = vld [vmem:[%s6927_s3 + $0x30] sm:$0xf]  ;;  %v4341_v51 = vld [vmem:[%s6927_s3 + $0x38] sm:$0xf0]  ;;  %v2981_v54 = vld [vmem:[%s6927_s3 + $0x3c] sm:$0xf0] }
  0x10   :  { %v2980_v53 = vor.u32 %v4341_v51, %v2979_v50  ;;  %v2987_v55 = vld [vmem:[%s6927_s3 + $0x38] sm:$0xf]  ;;  %v4342_v56 = vld [vmem:[%s6927_s3 + $0x40] sm:$0xf0]  ;;  %v2984_v57 = vor.u32 %v4340_v52, %v2981_v54  ;;  %v4337_v61 = vld [vmem:[%s6927_s3 + $0x1c] sm:$0xf] }
  0x11   :  { %2952 = vmatmul.msk.bf16.vlgmr.msra.gmra.mxu0 %vm77_vm0, %v4329_v37  ;;  %269 = vmatpush.bf16.msra.mxu1 %v3004_v38  ;;  %v2988_v58 = vor.u32 %v4342_v56, %v2987_v55  ;;  %v2967_v59 = vld [vmem:[%s6927_s3 + $0x18] sm:$0xf]  ;;  %v4338_v60 = vld [vmem:[%s6927_s3 + $0x20] sm:$0xf0]  ;;  %v2969_v63 = vld [vmem:[%s6927_s3 + $0x24] sm:$0xf0] }
  0x12   :  { %283 = vmatpush.bf16.msra.mxu2 %v3008_v39  ;;  %297 = vmatpush.bf16.msra.mxu3 %v3012_v40  ;;  %v2968_v62 = vor.u32 %v4338_v60, %v2967_v59  ;;  %v2975_v0 = vld [vmem:[%s6927_s3 + $0x20] sm:$0xf]  ;;  %v4339_v1 = vld [vmem:[%s6927_s3 + $0x28] sm:$0xf0]  ;;  %v2972_v2 = vor.u32 %v4337_v61, %v2969_v63  ;;  %v4334_v6 = vld [vmem:[%s6927_s3 + $0x4] sm:$0xf] }
  0x13   :  { %v2976_v3 = vor.u32 %v4339_v1, %v2975_v0  ;;  %v2955_v4 = vld [vmem:[%s6927_s3] sm:$0xf]  ;;  %v4335_v5 = vld [vmem:[%s6927_s3 + $0x8] sm:$0xf0]  ;;  %v2957_v8 = vld [vmem:[%s6927_s3 + $0xc] sm:$0xf0] }
  0x14   :  { %v2956_v7 = vor.u32 %v4335_v5, %v2955_v4  ;;  %v2963_v9 = vld [vmem:[%s6927_s3 + $0x8] sm:$0xf]  ;;  %v4336_v10 = vld [vmem:[%s6927_s3 + $0x10] sm:$0xf0]  ;;  %v2960_v11 = vor.u32 %v4334_v6, %v2957_v8  ;;  %v3163_v13 = vld [vmem:[%s6929_s5 + $0xe0] sm:$0xf] }
  0x15   :  { %270 = vmatpush.bf16.msra.mxu1 %v2992_v44  ;;  %v2964_v12 = vor.u32 %v4336_v10, %v2963_v9  ;;  %v4388_v14 = vld [vmem:[%s6929_s5 + $0xec] sm:$0xf0]  ;;  %v4386_v15 = vld [vmem:[%s6929_s5 + $0xe4] sm:$0xf]  ;;  %v3165_v17 = vld [vmem:[%s6929_s5 + $0xf0] sm:$0xf0] }
  0x16   :  { %284 = vmatpush.bf16.msra.mxu2 %v2996_v48  ;;  %298 = vmatpush.bf16.msra.mxu3 %v3000_v49  ;;  %v3164_v16 = vor.u32 %v4388_v14, %v3163_v13  ;;  %v3147_v18 = vld [vmem:[%s6929_s5 + $0xc0] sm:$0xf]  ;;  %v4384_v19 = vld [vmem:[%s6929_s5 + $0xcc] sm:$0xf0]  ;;  %v3168_v20 = vor.u32 %v4386_v15, %v3165_v17  ;;  %v4382_v21 = vld [vmem:[%s6929_s5 + $0xc4] sm:$0xf] }
  0x17   :  { %v3149_v22 = vld [vmem:[%s6929_s5 + $0xd0] sm:$0xf0]  ;;  %v3291_v23 = vld [vmem:[%s6929_s5 + $0x1e0] sm:$0xf]  ;;  %v3148_v24 = vor.u32 %v4384_v19, %v3147_v18  ;;  %v4420_v25 = vld [vmem:[%s6929_s5 + $0x1ec] sm:$0xf0] }
  0x18   :  { %903 = vmatpush.bf16.msrb.mxu0 %v3164_v16  ;;  %v3419_v26 = vld [vmem:[%s6929_s5 + $0x2e0] sm:$0xf]  ;;  %v4452_v27 = vld [vmem:[%s6929_s5 + $0x2ec] sm:$0xf0]  ;;  %v3152_v28 = vor.u32 %v4382_v21, %v3149_v22  ;;  %v3292_v29 = vor.u32 %v4420_v25, %v3291_v23  ;;  %v4378_v33 = vld [vmem:[%s6929_s5 + $0xa4] sm:$0xf] }
  0x19   :  { %271 = vmatpush.bf16.msra.mxu1 %v2980_v53  ;;  %v3420_v30 = vor.u32 %v4452_v27, %v3419_v26  ;;  %v3131_v31 = vld [vmem:[%s6929_s5 + $0xa0] sm:$0xf]  ;;  %v4380_v32 = vld [vmem:[%s6929_s5 + $0xac] sm:$0xf0]  ;;  %v3133_v34 = vld [vmem:[%s6929_s5 + $0xb0] sm:$0xf0] }
  0x1a   :  { %285 = vmatpush.bf16.msra.mxu2 %v2984_v57  ;;  %299 = vmatpush.bf16.msra.mxu3 %v2988_v58  ;;  %v3275_v35 = vld [vmem:[%s6929_s5 + $0x1c0] sm:$0xf]  ;;  %v4416_v36 = vld [vmem:[%s6929_s5 + $0x1cc] sm:$0xf0]  ;;  %v3132_v40 = vor.u32 %v4380_v32, %v3131_v31  ;;  %v3136_v44 = vor.u32 %v4378_v33, %v3133_v34  ;;  %v4374_v48 = vld [vmem:[%s6929_s5 + $0x84] sm:$0xf] }
  0x1b   :  { %v3276_v37 = vor.u32 %v4416_v36, %v3275_v35  ;;  %v3403_v38 = vld [vmem:[%s6929_s5 + $0x2c0] sm:$0xf]  ;;  %v4448_v39 = vld [vmem:[%s6929_s5 + $0x2cc] sm:$0xf0]  ;;  %v3117_v49 = vld [vmem:[%s6929_s5 + $0x90] sm:$0xf0] }
  0x1c   :  { %904 = vmatpush.bf16.msrb.mxu0 %v3148_v24  ;;  %v3404_v41 = vor.u32 %v4448_v39, %v3403_v38  ;;  %v3115_v42 = vld [vmem:[%s6929_s5 + $0x80] sm:$0xf]  ;;  %v4376_v43 = vld [vmem:[%s6929_s5 + $0x8c] sm:$0xf0]  ;;  %v3120_v58 = vor.u32 %v4374_v48, %v3117_v49  ;;  %v4370_v61 = vld [vmem:[%s6929_s5 + $0x64] sm:$0xf] }
  0x1d   :  { %272 = vmatpush.bf16.msra.mxu1 %v2968_v62  ;;  %v3259_v45 = vld [vmem:[%s6929_s5 + $0x1a0] sm:$0xf]  ;;  %v4412_v46 = vld [vmem:[%s6929_s5 + $0x1ac] sm:$0xf0]  ;;  %v3116_v54 = vor.u32 %v4376_v43, %v3115_v42  ;;  %v3101_v62 = vld [vmem:[%s6929_s5 + $0x70] sm:$0xf0] }
  0x1e   :  { %286 = vmatpush.bf16.msra.mxu2 %v2972_v2  ;;  %300 = vmatpush.bf16.msra.mxu3 %v2976_v3  ;;  %v3387_v47 = vld [vmem:[%s6929_s5 + $0x2a0] sm:$0xf]  ;;  %v4444_v50 = vld [vmem:[%s6929_s5 + $0x2ac] sm:$0xf0]  ;;  %v3260_v51 = vor.u32 %v4412_v46, %v3259_v45  ;;  %v4366_v10 = vld [vmem:[%s6929_s5 + $0x44] sm:$0xf] }
  0x1f   :  { %v3388_v52 = vor.u32 %v4444_v50, %v3387_v47  ;;  %v3243_v53 = vld [vmem:[%s6929_s5 + $0x180] sm:$0xf]  ;;  %v4408_v55 = vld [vmem:[%s6929_s5 + $0x18c] sm:$0xf0]  ;;  %v4362_v23 = vld [vmem:[%s6929_s5 + $0x24] sm:$0xf] }
  0x20   :  { %905 = vmatpush.bf16.msrb.mxu0 %v3132_v40  ;;  %v3371_v56 = vld [vmem:[%s6929_s5 + $0x280] sm:$0xf]  ;;  %v4440_v57 = vld [vmem:[%s6929_s5 + $0x28c] sm:$0xf0]  ;;  %v3244_v63 = vor.u32 %v4408_v55, %v3243_v53  ;;  %v3069_v24 = vld [vmem:[%s6929_s5 + $0x30] sm:$0xf0] }
  0x21   :  { %273 = vmatpush.bf16.msra.mxu1 %v2956_v7  ;;  %v3099_v59 = vld [vmem:[%s6929_s5 + $0x60] sm:$0xf]  ;;  %v4372_v60 = vld [vmem:[%s6929_s5 + $0x6c] sm:$0xf0]  ;;  %v3372_v0 = vor.u32 %v4440_v57, %v3371_v56  ;;  %v3104_v7 = vor.u32 %v4370_v61, %v3101_v62  ;;  %v3072_v34 = vor.u32 %v4362_v23, %v3069_v24  ;;  %v3053_v39 = vld [vmem:[%s6929_s5 + $0x10] sm:$0xf0] }
  0x22   :  { %287 = vmatpush.bf16.msra.mxu2 %v2960_v11  ;;  %301 = vmatpush.bf16.msra.mxu3 %v2964_v12  ;;  %v3227_v1 = vld [vmem:[%s6929_s5 + $0x160] sm:$0xf]  ;;  %v3100_v2 = vor.u32 %v4372_v60, %v3099_v59  ;;  %v4404_v3 = vld [vmem:[%s6929_s5 + $0x16c] sm:$0xf0]  ;;  %v3085_v11 = vld [vmem:[%s6929_s5 + $0x50] sm:$0xf0] }
  0x23   :  { %v3355_v4 = vld [vmem:[%s6929_s5 + $0x260] sm:$0xf]  ;;  %v4436_v5 = vld [vmem:[%s6929_s5 + $0x26c] sm:$0xf0]  ;;  %v3228_v13 = vor.u32 %v4404_v3, %v3227_v1  ;;  %v4418_v40 = vld [vmem:[%s6929_s5 + $0x1e4] sm:$0xf] }
  0x24   :  { %906 = vmatpush.bf16.msrb.mxu0 %v3116_v54  ;;  %v3083_v8 = vld [vmem:[%s6929_s5 + $0x40] sm:$0xf]  ;;  %v4368_v9 = vld [vmem:[%s6929_s5 + $0x4c] sm:$0xf0]  ;;  %v3356_v14 = vor.u32 %v4436_v5, %v3355_v4  ;;  %v3299_v42 = vld [vmem:[%s6929_s5 + $0x1e8] sm:$0xf] }
  0x25   :  { %917 = vmatpush.bf16.msrb.mxu1 %v3292_v29  ;;  %v4681_v12 = vld [vmem:[%s6926_s2] ss:$0 sm:$0xff]  ;;  %v3084_v16 = vor.u32 %v4368_v9, %v3083_v8  ;;  %v4400_v17 = vld [vmem:[%s6929_s5 + $0x14c] sm:$0xf0]  ;;  %v4421_v43 = vld [vmem:[%s6929_s5 + $0x1f4] sm:$0xf0] }
  0x26   :  { %945 = vmatpush.bf16.msrb.mxu3 %v3168_v20  ;;  %931 = vmatpush.bf16.msrb.mxu2 %v3420_v30  ;;  %v3211_v15 = vld [vmem:[%s6929_s5 + $0x140] sm:$0xf]  ;;  %v4432_v19 = vld [vmem:[%s6929_s5 + $0x24c] sm:$0xf0]  ;;  %v3088_v20 = vor.u32 %v4366_v10, %v3085_v11  ;;  %v4450_v53 = vld [vmem:[%s6929_s5 + $0x2e4] sm:$0xf]  ;;  %v3300_v60 = vor.u32 %v4421_v43, %v3299_v42 }
  0x27   :  { %v3339_v18 = vld [vmem:[%s6929_s5 + $0x240] sm:$0xf]  ;;  %v4364_v22 = vld [vmem:[%s6929_s5 + $0x2c] sm:$0xf0]  ;;  %v3212_v25 = vor.u32 %v4400_v17, %v3211_v15  ;;  %v3421_v54 = vld [vmem:[%s6929_s5 + $0x2f0] sm:$0xf0] }
  0x28   :  { %907 = vmatpush.bf16.msrb.mxu0 %v3100_v2  ;;  %v3067_v21 = vld [vmem:[%s6929_s5 + $0x20] sm:$0xf]  ;;  %v3340_v26 = vor.u32 %v4432_v19, %v3339_v18  ;;  %v4396_v30 = vld [vmem:[%s6929_s5 + $0x12c] sm:$0xf0]  ;;  %v4389_v59 = vld [vmem:[%s6929_s5 + $0xf4] sm:$0xf0]  ;;  %v3424_v3 = vor.u32 %v4450_v53, %v3421_v54 }
  0x29   :  { %918 = vmatpush.bf16.msrb.mxu1 %v3276_v37  ;;  %v3195_v27 = vld [vmem:[%s6929_s5 + $0x120] sm:$0xf]  ;;  %v3068_v29 = vor.u32 %v4364_v22, %v3067_v21  ;;  %v4428_v32 = vld [vmem:[%s6929_s5 + $0x22c] sm:$0xf0]  ;;  %v4358_v37 = vld [vmem:[%s6929_s5 + $0x4] sm:$0xf] }
  0x2a   :  { %946 = vmatpush.bf16.msrb.mxu3 %v3152_v28  ;;  %932 = vmatpush.bf16.msrb.mxu2 %v3404_v41  ;;  %v3323_v31 = vld [vmem:[%s6929_s5 + $0x220] sm:$0xf]  ;;  %v4360_v36 = vld [vmem:[%s6929_s5 + $0xc] sm:$0xf0]  ;;  %v3293_v41 = vld [vmem:[%s6929_s5 + $0x1f0] sm:$0xf0]  ;;  %v3056_v56 = vor.u32 %v4358_v37, %v3053_v39 }
  0x2b   :  { %v3051_v35 = vld [vmem:[%s6929_s5] sm:$0xf]  ;;  %v3324_v45 = vor.u32 %v4428_v32, %v3323_v31  ;;  %v4392_v49 = vld [vmem:[%s6929_s5 + $0x10c] sm:$0xf0]  ;;  %v3296_v57 = vor.u32 %v4418_v40, %v3293_v41  ;;  %v4414_v61 = vld [vmem:[%s6929_s5 + $0x1c4] sm:$0xf] }
  0x2c   :  { %908 = vmatpush.bf16.msrb.mxu0 %v3084_v16  ;;  %v3179_v46 = vld [vmem:[%s6929_s5 + $0x100] sm:$0xf]  ;;  %v3277_v62 = vld [vmem:[%s6929_s5 + $0x1d0] sm:$0xf0]  ;;  %v4417_v1 = vld [vmem:[%s6929_s5 + $0x1d4] sm:$0xf0] }
  0x2d   :  { %919 = vmatpush.bf16.msrb.mxu1 %v3260_v51  ;;  %v3307_v50 = vld [vmem:[%s6929_s5 + $0x200] sm:$0xf]  ;;  %v3052_v51 = vor.u32 %v4360_v36, %v3051_v35  ;;  %v4446_v5 = vld [vmem:[%s6929_s5 + $0x2c4] sm:$0xf]  ;;  %v3155_v8 = vld [vmem:[%s6929_s5 + $0xc8] sm:$0xf] }
  0x2e   :  { %947 = vmatpush.bf16.msrb.mxu3 %v3136_v44  ;;  %933 = vmatpush.bf16.msrb.mxu2 %v3388_v52  ;;  %v3196_v44 = vor.u32 %v4396_v30, %v3195_v27  ;;  %v4424_v52 = vld [vmem:[%s6929_s5 + $0x20c] sm:$0xf0]  ;;  %v4385_v9 = vld [vmem:[%s6929_s5 + $0xd4] sm:$0xf0]  ;;  %v4410_v11 = vld [vmem:[%s6929_s5 + $0x1a4] sm:$0xf] }
  0x2f   :  { %v3308_v2 = vor.u32 %v4424_v52, %v3307_v50  ;;  %v3156_v16 = vor.u32 %v4385_v9, %v3155_v8  ;;  %v4406_v19 = vld [vmem:[%s6929_s5 + $0x184] sm:$0xf]  ;;  %v3251_v21 = vld [vmem:[%s6929_s5 + $0x188] sm:$0xf]  ;;  %v4409_v22 = vld [vmem:[%s6929_s5 + $0x194] sm:$0xf0] }
  0x30   :  { %909 = vmatpush.bf16.msrb.mxu0 %v3068_v29  ;;  %v3252_v24 = vor.u32 %v4409_v22, %v3251_v21  ;;  %v3139_v27 = vld [vmem:[%s6929_s5 + $0xa8] sm:$0xf]  ;;  %v4381_v29 = vld [vmem:[%s6929_s5 + $0xb4] sm:$0xf0]  ;;  %v4402_v31 = vld [vmem:[%s6929_s5 + $0x164] sm:$0xf] }
  0x31   :  { %920 = vmatpush.bf16.msrb.mxu1 %v3244_v63  ;;  %v3180_v63 = vor.u32 %v4392_v49, %v3179_v46  ;;  %v3140_v30 = vor.u32 %v4381_v29, %v3139_v27  ;;  %v3229_v32 = vld [vmem:[%s6929_s5 + $0x170] sm:$0xf0]  ;;  %v4405_v35 = vld [vmem:[%s6929_s5 + $0x174] sm:$0xf0]  ;;  %v4438_v37 = vld [vmem:[%s6929_s5 + $0x284] sm:$0xf] }
  0x32   :  { %948 = vmatpush.bf16.msrb.mxu3 %v3120_v58  ;;  %934 = vmatpush.bf16.msrb.mxu2 %v3372_v0  ;;  %v3171_v58 = vld [vmem:[%s6929_s5 + $0xe8] sm:$0xf]  ;;  %v4377_v41 = vld [vmem:[%s6929_s5 + $0x94] sm:$0xf0]  ;;  %v4398_v43 = vld [vmem:[%s6929_s5 + $0x144] sm:$0xf] }
  0x33   :  { %v3283_v0 = vld [vmem:[%s6929_s5 + $0x1c8] sm:$0xf]  ;;  %v3172_v4 = vor.u32 %v4389_v59, %v3171_v58  ;;  %v4434_v49 = vld [vmem:[%s6929_s5 + $0x264] sm:$0xf]  ;;  %v3357_v50 = vld [vmem:[%s6929_s5 + $0x270] sm:$0xf0] }
  0x34   :  { %910 = vmatpush.bf16.msrb.mxu0 %v3052_v51  ;;  %v3284_v10 = vor.u32 %v4417_v1, %v3283_v0  ;;  %v3123_v39 = vld [vmem:[%s6929_s5 + $0x88] sm:$0xf]  ;;  %v3360_v52 = vor.u32 %v4434_v49, %v3357_v50  ;;  %v4373_v53 = vld [vmem:[%s6929_s5 + $0x74] sm:$0xf0]  ;;  %v4426_v9 = vld [vmem:[%s6929_s5 + $0x224] sm:$0xf] }
  0x35   :  { %921 = vmatpush.bf16.msrb.mxu1 %v3228_v13  ;;  %v3267_v13 = vld [vmem:[%s6929_s5 + $0x1a8] sm:$0xf]  ;;  %v3124_v42 = vor.u32 %v4377_v41, %v3123_v39  ;;  %v4397_v59 = vld [vmem:[%s6929_s5 + $0x134] sm:$0xf0]  ;;  %v130_v21 = vld [vmem:[%s6928_s4] sm:$0x7] }
  0x36   :  { %949 = vmatpush.bf16.msrb.mxu3 %v3104_v7  ;;  %935 = vmatpush.bf16.msrb.mxu2 %v3356_v14  ;;  %v3280_v7 = vor.u32 %v4414_v61, %v3277_v62  ;;  %v4413_v14 = vld [vmem:[%s6929_s5 + $0x1b4] sm:$0xf0]  ;;  %v3107_v51 = vld [vmem:[%s6929_s5 + $0x68] sm:$0xf]  ;;  %v4430_v61 = vld [vmem:[%s6929_s5 + $0x244] sm:$0xf] }
  0x37   :  { %v3268_v18 = vor.u32 %v4413_v14, %v3267_v13  ;;  %v3108_v54 = vor.u32 %v4373_v53, %v3107_v51  ;;  %v3341_v62 = vld [vmem:[%s6929_s5 + $0x250] sm:$0xf0]  ;;  %v4369_v1 = vld [vmem:[%s6929_s5 + $0x54] sm:$0xf0]  ;;  %v133_v27 = vperm.slane %v130_v21, 1  ;;  %vm2905_vm1 = vcmask 130048  }
  0x38   :  { %959 = vmatpush.bf16.msra.mxu0 %v3296_v57  ;;  %v3203_v57 = vld [vmem:[%s6929_s5 + $0x128] sm:$0xf]  ;;  %v3344_v0 = vor.u32 %v4430_v61, %v3341_v62  ;;  %v4387_v49 = vld [vmem:[%s6929_s5 + $0xec] sm:$0xf]  ;;  %v3173_v50 = vld [vmem:[%s6929_s5 + $0xf8] sm:$0xf0] }
  0x39   :  { %922 = vmatpush.bf16.msrb.mxu1 %v3212_v25  ;;  %v4442_v25 = vld [vmem:[%s6929_s5 + $0x2a4] sm:$0xf]  ;;  %v3427_v29 = vld [vmem:[%s6929_s5 + $0x2e8] sm:$0xf]  ;;  %v4419_v51 = vld [vmem:[%s6929_s5 + $0x1ec] sm:$0xf] }
  0x3a   :  { %950 = vmatpush.bf16.msrb.mxu3 %v3088_v20  ;;  %936 = vmatpush.bf16.msrb.mxu2 %v3340_v26  ;;  %v3245_v20 = vld [vmem:[%s6929_s5 + $0x190] sm:$0xf0]  ;;  %v3411_v39 = vld [vmem:[%s6929_s5 + $0x2c8] sm:$0xf]  ;;  %v3397_v61 = vld [vmem:[%s6929_s5 + $0x2b8] sm:$0xf0] }
  0x3b   :  { %v3248_v23 = vor.u32 %v4406_v19, %v3245_v20  ;;  %v3389_v26 = vld [vmem:[%s6929_s5 + $0x2b0] sm:$0xf0]  ;;  %v4361_v19 = vld [vmem:[%s6929_s5 + $0x14] sm:$0xf0]  ;;  %s2920_s26 = sshll.u32 %s6933_s9, 4  ;;  %s4709_s2 = smov 896   ;;  %s2921_s26 = int_to_ptr.hbm [resolvable:$true] %s2920_s26 }
  0x3c   :  { %960 = vmatpush.bf16.msra.mxu0 %v3280_v7  ;;  %v4393_v7 = vld [vmem:[%s6929_s5 + $0x114] sm:$0xf0] }
  0x3d   :  { %923 = vmatpush.bf16.msrb.mxu1 %v3196_v44  ;;  %v3213_v44 = vld [vmem:[%s6929_s5 + $0x150] sm:$0xf0] }
  0x3e   :  { %951 = vmatpush.bf16.msrb.mxu3 %v3072_v34  ;;  %937 = vmatpush.bf16.msrb.mxu2 %v3324_v45  ;;  %v3232_v34 = vor.u32 %v4402_v31, %v3229_v32  ;;  %v3219_v45 = vld [vmem:[%s6929_s5 + $0x148] sm:$0xf]  ;;  %v3216_v46 = vor.u32 %v4398_v43, %v3213_v44  ;;  %v4453_v31 = vld [vmem:[%s6929_s5 + $0x2f4] sm:$0xf0]  ;;  %v4451_v32 = vld [vmem:[%s6929_s5 + $0x2ec] sm:$0xf] }
  0x3f   :  { %v4447_v43 = vld [vmem:[%s6929_s5 + $0x2cc] sm:$0xf]  ;;  %v3413_v44 = vld [vmem:[%s6929_s5 + $0x2d8] sm:$0xf0] }
  0x41   :  { %924 = vmatpush.bf16.msrb.mxu1 %v3180_v63  ;;  %v3091_v63 = vld [vmem:[%s6929_s5 + $0x48] sm:$0xf] }
  0x42   :  { %952 = vmatpush.bf16.msrb.mxu3 %v3056_v56  ;;  %938 = vmatpush.bf16.msrb.mxu2 %v3308_v2  ;;  %v3197_v56 = vld [vmem:[%s6929_s5 + $0x130] sm:$0xf0]  ;;  %v3092_v2 = vor.u32 %v4369_v1, %v3091_v63 }
  0x8e   :  { %v90_v6 = vpop.f32.mrf.mxu0 }
  0x8f   :  { %v91_v28 = vadd.f32 %v4681_v12, %v90_v6  ;;  %v3405_v6 = vld [vmem:[%s6929_s5 + $0x2d0] sm:$0xf0] }
  0x90   :  { %v3408_v15 = vor.u32 %v4446_v5, %v3405_v6  ;;  %v3187_v5 = vld [vmem:[%s6929_s5 + $0x108] sm:$0xf] }
  0x91   :  { %v95_v47 = vmax.f32 %v91_v28, 0.0  ;;  %v3392_v28 = vor.u32 %v4442_v25, %v3389_v26  ;;  %v3188_v8 = vor.u32 %v4393_v7, %v3187_v5 }
  0x96   :  { %v92_v33 = vpop.f32.mrf.mxu0 }
  0x97   :  { %v93_v38 = vadd.f32 %v4681_v12, %v92_v33  ;;  %v3261_v12 = vld [vmem:[%s6929_s5 + $0x1b0] sm:$0xf0]  ;;  %v3235_v33 = vld [vmem:[%s6929_s5 + $0x168] sm:$0xf] }
  0x98   :  { %v3264_v17 = vor.u32 %v4410_v11, %v3261_v12  ;;  %v3236_v36 = vor.u32 %v4405_v35, %v3235_v33  ;;  %v3075_v11 = vld [vmem:[%s6929_s5 + $0x28] sm:$0xf]  ;;  %v4365_v12 = vld [vmem:[%s6929_s5 + $0x34] sm:$0xf0]  ;;  %v3429_v33 = vld [vmem:[%s6929_s5 + $0x2f8] sm:$0xf0] }
  0x99   :  { %v96_v48 = vmax.f32 %v93_v38, 0.0  ;;  %v3373_v38 = vld [vmem:[%s6929_s5 + $0x290] sm:$0xf0]  ;;  %v3076_v14 = vor.u32 %v4365_v12, %v3075_v11  ;;  %v4441_v11 = vld [vmem:[%s6929_s5 + $0x294] sm:$0xf0] }
  0x9a   :  { %961 = vmatpush.bf16.msra.mxu0 %v3264_v17  ;;  %v3376_v40 = vor.u32 %v4438_v37, %v3373_v38  ;;  %v3428_v37 = vor.u32 %v4453_v31, %v3427_v29  ;;  %v3432_v38 = vor.u32 %v4451_v32, %v3429_v33  ;;  %v4439_v12 = vld [vmem:[%s6929_s5 + $0x28c] sm:$0xf]  ;;  %v3125_v29 = vld [vmem:[%s6929_s5 + $0x98] sm:$0xf0] }
  0x9b   :  { %v97_v55 = vpack.c.bf16 %v96_v48, %v95_v47  ;;  %v4401_v47 = vld [vmem:[%s6929_s5 + $0x154] sm:$0xf0]  ;;  %v4407_v31 = vld [vmem:[%s6929_s5 + $0x18c] sm:$0xf]  ;;  %v3253_v32 = vld [vmem:[%s6929_s5 + $0x198] sm:$0xf0] }
  0x9c   :  { %v3220_v48 = vor.u32 %v4401_v47, %v3219_v45 }
  0x9d   :  { %274 = vmatmul.bf16.vlgmr.msra.gmra.mxu1 %v97_v55  ;;  %288 = vmatmul.bf16.vlgmr.msra.gmra.mxu2 %v97_v55 }
  0x9e   :  { %302 = vmatmul.bf16.vlgmr.msra.gmra.mxu3 %v97_v55  ;;  %973 = vmatpush.bf16.msra.mxu1 %v3424_v3  ;;  %v4394_v55 = vld [vmem:[%s6929_s5 + $0x124] sm:$0xf] }
  0x9f   :  { %1001 = vmatpush.bf16.msra.mxu3 %v3300_v60  ;;  %987 = vmatpush.bf16.msra.mxu2 %v3172_v4  ;;  %v3200_v58 = vor.u32 %v4394_v55, %v3197_v56  ;;  %v3204_v60 = vor.u32 %v4397_v59, %v3203_v57  ;;  %v4390_v3 = vld [vmem:[%s6929_s5 + $0x104] sm:$0xf]  ;;  %v3181_v4 = vld [vmem:[%s6929_s5 + $0x110] sm:$0xf0]  ;;  %v3301_v55 = vld [vmem:[%s6929_s5 + $0x1f8] sm:$0xf0] }
  0xa0   :  { %962 = vmatpush.bf16.msra.mxu0 %v3248_v23  ;;  %v3184_v6 = vor.u32 %v4390_v3, %v3181_v4  ;;  %v132_v23 = vperm.slane %v130_v21, 0  ;;  %v3395_v56 = vld [vmem:[%s6929_s5 + $0x2a8] sm:$0xf]  ;;  %v4445_v57 = vld [vmem:[%s6929_s5 + $0x2b4] sm:$0xf0] }
  0xa1   :  { %v4383_v3 = vld [vmem:[%s6929_s5 + $0xcc] sm:$0xf]  ;;  %v3157_v4 = vld [vmem:[%s6929_s5 + $0xd8] sm:$0xf0] }
  0xa2   :  { %974 = vmatpush.bf16.msra.mxu1 %v3408_v15  ;;  %v4422_v15 = vld [vmem:[%s6929_s5 + $0x204] sm:$0xf] }
  0xa3   :  { %1002 = vmatpush.bf16.msra.mxu3 %v3284_v10  ;;  %988 = vmatpush.bf16.msra.mxu2 %v3156_v16  ;;  %v3325_v10 = vld [vmem:[%s6929_s5 + $0x230] sm:$0xf0] }
  0xa4   :  { %963 = vmatpush.bf16.msra.mxu0 %v3232_v34  ;;  %v3328_v13 = vor.u32 %v4426_v9, %v3325_v10  ;;  %v3309_v16 = vld [vmem:[%s6929_s5 + $0x210] sm:$0xf0]  ;;  %v134_v34 = vperm.slane %v130_v21, 2  ;;  %v3285_v9 = vld [vmem:[%s6929_s5 + $0x1d8] sm:$0xf0] }
  0xa5   :  { %v3312_v17 = vor.u32 %v4422_v15, %v3309_v16  ;;  %v3379_v10 = vld [vmem:[%s6929_s5 + $0x288] sm:$0xf]  ;;  %v4379_v16 = vld [vmem:[%s6929_s5 + $0xac] sm:$0xf]  ;;  %v3269_v21 = vld [vmem:[%s6929_s5 + $0x1b8] sm:$0xf0] }
  0xa6   :  { %975 = vmatpush.bf16.msra.mxu1 %v3392_v28 }
  0xa7   :  { %1003 = vmatpush.bf16.msra.mxu3 %v3268_v18  ;;  %989 = vmatpush.bf16.msra.mxu2 %v3140_v30  ;;  %v3059_v18 = vld [vmem:[%s6929_s5 + $0x8] sm:$0xf] }
  0xa8   :  { %964 = vmatpush.bf16.msra.mxu0 %v3216_v46  ;;  %v3060_v20 = vor.u32 %v4361_v19, %v3059_v18  ;;  %v3380_v18 = vor.u32 %v4441_v11, %v3379_v10 }
  0xaa   :  { %976 = vmatpush.bf16.msra.mxu1 %v3376_v40 }
  0xab   :  { %1004 = vmatpush.bf16.msra.mxu3 %v3252_v24  ;;  %990 = vmatpush.bf16.msra.mxu2 %v3124_v42  ;;  %v4449_v42 = vld [vmem:[%s6929_s5 + $0x2d4] sm:$0xf0] }
  0xac   :  { %965 = vmatpush.bf16.msra.mxu0 %v3200_v58  ;;  %v3412_v53 = vor.u32 %v4449_v42, %v3411_v39  ;;  %v3256_v39 = vor.u32 %v4407_v31, %v3253_v32  ;;  %v3109_v42 = vld [vmem:[%s6929_s5 + $0x78] sm:$0xf0]  ;;  %v4555_v31 = vld [vmem:[%s6931_s7 + $0x328] sm:$0xf0] }
  0xae   :  { %977 = vmatpush.bf16.msra.mxu1 %v3360_v52 }
  0xaf   :  { %1005 = vmatpush.bf16.msra.mxu3 %v3236_v36  ;;  %991 = vmatpush.bf16.msra.mxu2 %v3108_v54  ;;  %v3416_v54 = vor.u32 %v4447_v43, %v3413_v44  ;;  %v4403_v44 = vld [vmem:[%s6929_s5 + $0x16c] sm:$0xf] }
  0xb0   :  { %966 = vmatpush.bf16.msra.mxu0 %v3184_v6  ;;  %v3396_v6 = vor.u32 %v4445_v57, %v3395_v56  ;;  %v4399_v56 = vld [vmem:[%s6929_s5 + $0x14c] sm:$0xf]  ;;  %v3221_v57 = vld [vmem:[%s6929_s5 + $0x158] sm:$0xf0] }
  0xb2   :  { %978 = vmatpush.bf16.msra.mxu1 %v3344_v0  ;;  %v3176_v0 = vor.u32 %v4387_v49, %v3173_v50  ;;  %v4427_v50 = vld [vmem:[%s6929_s5 + $0x22c] sm:$0xf] }
  0xb3   :  { %1006 = vmatpush.bf16.msra.mxu3 %v3220_v48  ;;  %992 = vmatpush.bf16.msra.mxu2 %v3092_v2  ;;  %v3304_v2 = vor.u32 %v4419_v51, %v3301_v55  ;;  %v3333_v51 = vld [vmem:[%s6929_s5 + $0x238] sm:$0xf0] }
  0xb6   :  { %979 = vmatpush.bf16.msra.mxu1 %v3328_v13  ;;  %v3381_v13 = vld [vmem:[%s6929_s5 + $0x298] sm:$0xf0] }
  0xb7   :  { %1007 = vmatpush.bf16.msra.mxu3 %v3204_v60  ;;  %993 = vmatpush.bf16.msra.mxu2 %v3076_v14  ;;  %v4443_v60 = vld [vmem:[%s6929_s5 + $0x2ac] sm:$0xf]  ;;  %v3160_v14 = vor.u32 %v4383_v3, %v3157_v4  ;;  %v3384_v19 = vor.u32 %v4439_v12, %v3381_v13  ;;  %v3224_v3 = vor.u32 %v4399_v56, %v3221_v57  ;;  %v3603_v13 = vld [vmem:[%s6931_s7 + $0x150] sm:$0xf]  ;;  %v3463_v56 = vld [vmem:[%s6931_s7 + $0x38] sm:$0xf] }
  0xb8   :  { %v3400_v7 = vor.u32 %v4443_v60, %v3397_v61  ;;  %v4425_v60 = vld [vmem:[%s6929_s5 + $0x214] sm:$0xf0]  ;;  %v4423_v61 = vld [vmem:[%s6929_s5 + $0x20c] sm:$0xf]  ;;  %v4464_v57 = vld [vmem:[%s6931_s7 + $0x50] sm:$0xf0] }
  0xb9   :  { %v4363_v4 = vld [vmem:[%s6929_s5 + $0x2c] sm:$0xf] }
  0xba   :  { %980 = vmatpush.bf16.msra.mxu1 %v3312_v17  ;;  %v3141_v17 = vld [vmem:[%s6929_s5 + $0xb8] sm:$0xf0] }
  0xbb   :  { %1008 = vmatpush.bf16.msra.mxu3 %v3188_v8  ;;  %994 = vmatpush.bf16.msra.mxu2 %v3060_v20  ;;  %v4415_v8 = vld [vmem:[%s6929_s5 + $0x1cc] sm:$0xf] }
  0xbc   :  { %v3288_v15 = vor.u32 %v4415_v8, %v3285_v9  ;;  %v4411_v20 = vld [vmem:[%s6929_s5 + $0x1ac] sm:$0xf]  ;;  %v3205_v9 = vld [vmem:[%s6929_s5 + $0x138] sm:$0xf0] }
  0xbd   :  { %v4395_v8 = vld [vmem:[%s6929_s5 + $0x12c] sm:$0xf] }
 0x11a   :  { %v275_v22 = vpop.f32.mrf.mxu1 }
 0x11b   :  { %v276_v25 = vadd.f32 %v275_v22, %v132_v23  ;;  %v3363_v22 = vld [vmem:[%s6929_s5 + $0x268] sm:$0xf] }
 0x11d   :  { %v308_v35 = vmax.f32 %v276_v25, 0.0  ;;  %v4435_v25 = vld [vmem:[%s6929_s5 + $0x26c] sm:$0xf] }
 0x120   :  { %v289_v24 = vpop.f32.mrf.mxu2 }
 0x121   :  { %v303_v26 = vpop.f32.mrf.mxu3  ;;  %v290_v40 = vadd.f32 %v289_v24, %v133_v27  ;;  %v3144_v24 = vor.u32 %v4379_v16, %v3141_v17  ;;  %v4359_v16 = vld [vmem:[%s6929_s5 + $0xc] sm:$0xf]  ;;  %v3061_v17 = vld [vmem:[%s6929_s5 + $0x18] sm:$0xf0] }
 0x122   :  { %v277_v28 = vpop.f32.mrf.mxu1  ;;  %v304_v45 = vadd.f32 %v303_v26, %v134_v34  ;;  %v3365_v26 = vld [vmem:[%s6929_s5 + $0x278] sm:$0xf0] }
 0x123   :  { %v278_v30 = vadd.f32 %v277_v28, %v132_v23  ;;  %v309_v58 = vmax.f32 %v290_v40, 0.0  ;;  %v4437_v23 = vld [vmem:[%s6929_s5 + $0x274] sm:$0xf0]  ;;  %v4375_v28 = vld [vmem:[%s6929_s5 + $0x8c] sm:$0xf]  ;;  %v3368_v33 = vor.u32 %v4435_v25, %v3365_v26  ;;  %v3064_v25 = vor.u32 %v4359_v16, %v3061_v17 }
 0x124   :  { %v310_v62 = vmax.f32 %v304_v45, 0.0  ;;  %v4371_v40 = vld [vmem:[%s6929_s5 + $0x6c] sm:$0xf]  ;;  %v3237_v45 = vld [vmem:[%s6929_s5 + $0x178] sm:$0xf0] }
 0x125   :  { %v311_v36 = vmax.f32 %v278_v30, 0.0  ;;  %v3364_v30 = vor.u32 %v4437_v23, %v3363_v22  ;;  %v3112_v49 = vor.u32 %v4371_v40, %v3109_v42  ;;  %v4079_v23 = vld [vmem:[%s6931_s7 + $0x508] sm:$0xf]  ;;  %v3575_v26 = vld [vmem:[%s6931_s7 + $0x118] sm:$0xf] }
 0x126   :  { %v4674_v17 = vld [vmem:[%s6931_s7 + $0x6e0] sm:$0xf0] }
 0x127   :  { %v5325_v41 = vpack.c.bf16 %v311_v36, %v308_v35  ;;  %v4433_v35 = vld [vmem:[%s6929_s5 + $0x254] sm:$0xf0]  ;;  %v3128_v36 = vor.u32 %v4375_v28, %v3125_v29 }
 0x128   :  { %v291_v46 = vpop.f32.mrf.mxu2 }
 0x129   :  { %v292_v47 = vadd.f32 %v291_v46, %v133_v27  ;;  %v305_v48 = vpop.f32.mrf.mxu3  ;;  %911 = vmatmul.bf16.vlgmr.msrb.gmra.mxu0 %v5325_v41  ;;  %953 = vmatmul.bf16.vlgmr.msrb.gmra.mxu3 %v5325_v41  ;;  %v3272_v27 = vor.u32 %v4411_v20, %v3269_v21  ;;  %v3855_v20 = vld [vmem:[%s6931_s7 + $0x348] sm:$0xf]  ;;  %v4562_v21 = vld [vmem:[%s6931_s7 + $0x360] sm:$0xf0] }
 0x12a   :  { %v306_v52 = vadd.f32 %v305_v48, %v134_v34  ;;  %1015 = vmatpush.bf16.msrb.mxu0 %v3428_v37  ;;  %1057 = vmatpush.bf16.msrb.mxu3 %v3432_v38  ;;  %v3347_v34 = vld [vmem:[%s6929_s5 + $0x248] sm:$0xf]  ;;  %v4431_v37 = vld [vmem:[%s6929_s5 + $0x24c] sm:$0xf]  ;;  %v3349_v38 = vld [vmem:[%s6929_s5 + $0x258] sm:$0xf0]  ;;  %v3856_v29 = vor.u32 %v4562_v21, %v3855_v20 }
 0x12b   :  { %v312_v59 = vmax.f32 %v292_v47, 0.0  ;;  %v3348_v43 = vor.u32 %v4433_v35, %v3347_v34  ;;  %v3352_v46 = vor.u32 %v4431_v37, %v3349_v38  ;;  %v3331_v47 = vld [vmem:[%s6929_s5 + $0x228] sm:$0xf]  ;;  %v4429_v48 = vld [vmem:[%s6929_s5 + $0x234] sm:$0xf0] }
 0x12c   :  { %v313_v63 = vmax.f32 %v306_v52, 0.0  ;;  %v3240_v52 = vor.u32 %v4403_v44, %v3237_v45  ;;  %v3332_v55 = vor.u32 %v4429_v48, %v3331_v47  ;;  %v4051_v34 = vld [vmem:[%s6931_s7 + $0x4d0] sm:$0xf]  ;;  %v4611_v35 = vld [vmem:[%s6931_s7 + $0x4e8] sm:$0xf0] }
 0x12d   :  { %v5362_v1 = vpack.c.bf16 %v312_v59, %v309_v58  ;;  %v3336_v58 = vor.u32 %v4427_v50, %v3333_v51  ;;  %v3315_v59 = vld [vmem:[%s6929_s5 + $0x208] sm:$0xf]  ;;  %v3799_v38 = vld [vmem:[%s6931_s7 + $0x2d8] sm:$0xf]  ;;  %v4052_v40 = vor.u32 %v4611_v35, %v4051_v34  ;;  %v4604_v44 = vld [vmem:[%s6931_s7 + $0x4b0] sm:$0xf0] }
 0x12e   :  { %v5370_v5 = vpack.c.bf16 %v313_v63, %v310_v62  ;;  %1016 = vmatpush.bf16.msrb.mxu0 %v3412_v53  ;;  %1058 = vmatpush.bf16.msrb.mxu3 %v3416_v54  ;;  %v4367_v53 = vld [vmem:[%s6929_s5 + $0x4c] sm:$0xf]  ;;  %v3093_v54 = vld [vmem:[%s6929_s5 + $0x58] sm:$0xf0]  ;;  %v3519_v45 = vld [vmem:[%s6931_s7 + $0xa8] sm:$0xf] }
 0x12f   :  { %925 = vmatmul.bf16.vlgmr.msrb.gmra.mxu1 %v5362_v1  ;;  %v3096_v62 = vor.u32 %v4367_v53, %v3093_v54  ;;  %v3317_v63 = vld [vmem:[%s6929_s5 + $0x218] sm:$0xf0]  ;;  %v3771_v47 = vld [vmem:[%s6931_s7 + $0x2a0] sm:$0xf]  ;;  %v3491_v50 = vld [vmem:[%s6931_s7 + $0x70] sm:$0xf] }
 0x130   :  { %939 = vmatmul.bf16.vlgmr.msrb.gmra.mxu2 %v5370_v5  ;;  %1029 = vmatpush.bf16.msrb.mxu1 %v3176_v0  ;;  %v3631_v0 = vld [vmem:[%s6931_s7 + $0x188] sm:$0xf]  ;;  %v3320_v10 = vor.u32 %v4423_v61, %v3317_v63  ;;  %v4541_v48 = vld [vmem:[%s6931_s7 + $0x2b8] sm:$0xf0]  ;;  %v4471_v51 = vld [vmem:[%s6931_s7 + $0x88] sm:$0xf0]  ;;  %v3464_v61 = vor.u32 %v4464_v57, %v3463_v56 }
 0x131   :  { %1043 = vmatpush.bf16.msrb.mxu2 %v3304_v2  ;;  %v4506_v2 = vld [vmem:[%s6931_s7 + $0x1a0] sm:$0xf0]  ;;  %v3743_v53 = vld [vmem:[%s6931_s7 + $0x268] sm:$0xf]  ;;  %v4457_v63 = vld [vmem:[%s6931_s7 + $0x18] sm:$0xf0] }
 0x132   :  { %1017 = vmatpush.bf16.msrb.mxu0 %v3396_v6  ;;  %1059 = vmatpush.bf16.msrb.mxu3 %v3400_v7  ;;  %v3077_v6 = vld [vmem:[%s6929_s5 + $0x38] sm:$0xf0]  ;;  %v3316_v7 = vor.u32 %v4425_v60, %v3315_v59  ;;  %v3632_v11 = vor.u32 %v4506_v2, %v3631_v0  ;;  %v4534_v54 = vld [vmem:[%s6931_s7 + $0x280] sm:$0xf0]  ;;  %v3715_v59 = vld [vmem:[%s6931_s7 + $0x230] sm:$0xf] }
 0x133   :  { %v3080_v12 = vor.u32 %v4363_v4, %v3077_v6  ;;  %v4527_v60 = vld [vmem:[%s6931_s7 + $0x248] sm:$0xf0]  ;;  %v3633_v2 = vld [vmem:[%s6931_s7 + $0x1a4] sm:$0xf0]  ;;  %v3883_v56 = vld [vmem:[%s6931_s7 + $0x380] sm:$0xf] }
 0x134   :  { %1030 = vmatpush.bf16.msrb.mxu1 %v3160_v14  ;;  %v4499_v14 = vld [vmem:[%s6931_s7 + $0x168] sm:$0xf0]  ;;  %v4569_v57 = vld [vmem:[%s6931_s7 + $0x398] sm:$0xf0] }
 0x135   :  { %1044 = vmatpush.bf16.msrb.mxu2 %v3288_v15  ;;  %v3208_v15 = vor.u32 %v4395_v8, %v3205_v9  ;;  %v3604_v22 = vor.u32 %v4499_v14, %v3603_v13  ;;  %v4503_v0 = vld [vmem:[%s6931_s7 + $0x18c] sm:$0xf]  ;;  %v4597_v8 = vld [vmem:[%s6931_s7 + $0x478] sm:$0xf0]  ;;  %v3687_v13 = vld [vmem:[%s6931_s7 + $0x1f8] sm:$0xf] }
 0x136   :  { %1018 = vmatpush.bf16.msrb.mxu0 %v3380_v18  ;;  %1060 = vmatpush.bf16.msrb.mxu3 %v3384_v19  ;;  %v4391_v18 = vld [vmem:[%s6929_s5 + $0x10c] sm:$0xf]  ;;  %v3189_v19 = vld [vmem:[%s6929_s5 + $0x118] sm:$0xf0]  ;;  %v3636_v6 = vor.u32 %v4503_v0, %v3633_v2  ;;  %v4520_v14 = vld [vmem:[%s6931_s7 + $0x210] sm:$0xf0] }
 0x137   :  { %v3192_v28 = vor.u32 %v4391_v18, %v3189_v19  ;;  %v3688_v16 = vor.u32 %v4520_v14, %v3687_v13  ;;  %v3967_v18 = vld [vmem:[%s6931_s7 + $0x428] sm:$0xf]  ;;  %v4590_v19 = vld [vmem:[%s6931_s7 + $0x440] sm:$0xf0]  ;;  %v4583_v34 = vld [vmem:[%s6931_s7 + $0x408] sm:$0xf0] }
 0x138   :  { %1031 = vmatpush.bf16.msrb.mxu1 %v3144_v24  ;;  %v4618_v24 = vld [vmem:[%s6931_s7 + $0x520] sm:$0xf0]  ;;  %v3968_v21 = vor.u32 %v4590_v19, %v3967_v18  ;;  %v4191_v0 = vld [vmem:[%s6931_s7 + $0x5e8] sm:$0xf]  ;;  %v4053_v13 = vld [vmem:[%s6931_s7 + $0x4ec] sm:$0xf0] }
 0x139   :  { %1045 = vmatpush.bf16.msrb.mxu2 %v3272_v27  ;;  %967 = vmatmul.bf16.vlgmr.msra.gmra.mxu0 %v5362_v1  ;;  %v4492_v27 = vld [vmem:[%s6931_s7 + $0x130] sm:$0xf0]  ;;  %v4080_v32 = vor.u32 %v4618_v24, %v4079_v23  ;;  %v3577_v23 = vld [vmem:[%s6931_s7 + $0x134] sm:$0xf0]  ;;  %v4646_v2 = vld [vmem:[%s6931_s7 + $0x600] sm:$0xf0] }
 0x13a   :  { %1009 = vmatmul.bf16.vlgmr.msra.gmra.mxu3 %v5362_v1  ;;  %1019 = vmatpush.bf16.msrb.mxu0 %v3364_v30  ;;  %v3827_v30 = vld [vmem:[%s6931_s7 + $0x310] sm:$0xf]  ;;  %v4531_v18 = vld [vmem:[%s6931_s7 + $0x26c] sm:$0xf]  ;;  %v3745_v19 = vld [vmem:[%s6931_s7 + $0x284] sm:$0xf0] }
 0x13b   :  { %1061 = vmatpush.bf16.msrb.mxu3 %v3368_v33  ;;  %v3576_v33 = vor.u32 %v4492_v27, %v3575_v26  ;;  %v3828_v37 = vor.u32 %v4555_v31, %v3827_v30  ;;  %v4513_v26 = vld [vmem:[%s6931_s7 + $0x1d8] sm:$0xf0]  ;;  %v4275_v27 = vld [vmem:[%s6931_s7 + $0x690] sm:$0xf]  ;;  %v4559_v30 = vld [vmem:[%s6931_s7 + $0x34c] sm:$0xf] }
 0x13c   :  { %1032 = vmatpush.bf16.msrb.mxu1 %v3128_v36  ;;  %v4485_v36 = vld [vmem:[%s6931_s7 + $0xf8] sm:$0xf0]  ;;  %v4163_v14 = vld [vmem:[%s6931_s7 + $0x5b0] sm:$0xf] }
 0x13d   :  { %1046 = vmatpush.bf16.msrb.mxu2 %v3256_v39  ;;  %v4548_v39 = vld [vmem:[%s6931_s7 + $0x2f0] sm:$0xf0] }
 0x13e   :  { %1020 = vmatpush.bf16.msrb.mxu0 %v3348_v43  ;;  %v4023_v43 = vld [vmem:[%s6931_s7 + $0x498] sm:$0xf] }
 0x13f   :  { %1062 = vmatpush.bf16.msrb.mxu3 %v3352_v46  ;;  %981 = vmatmul.bf16.vlgmr.msra.gmra.mxu1 %v5370_v5  ;;  %v3800_v46 = vor.u32 %v4548_v39, %v3799_v38  ;;  %v4247_v39 = vld [vmem:[%s6931_s7 + $0x658] sm:$0xf] }
 0x140   :  { %995 = vmatmul.bf16.vlgmr.msra.gmra.mxu2 %v5325_v41  ;;  %1033 = vmatpush.bf16.msrb.mxu1 %v3112_v49 }
 0x141   :  { %1047 = vmatpush.bf16.msrb.mxu2 %v3240_v52  ;;  %v3772_v52 = vor.u32 %v4541_v48, %v3771_v47  ;;  %v4475_v48 = vld [vmem:[%s6931_s7 + $0xac] sm:$0xf] }
 0x142   :  { %1021 = vmatpush.bf16.msrb.mxu0 %v3332_v55  ;;  %v3492_v55 = vor.u32 %v4471_v51, %v3491_v50  ;;  %v4219_v50 = vld [vmem:[%s6931_s7 + $0x620] sm:$0xf]  ;;  %v4653_v51 = vld [vmem:[%s6931_s7 + $0x638] sm:$0xf0] }
 0x143   :  { %1063 = vmatpush.bf16.msrb.mxu3 %v3336_v58  ;;  %v3744_v58 = vor.u32 %v4534_v54, %v3743_v53  ;;  %v4545_v53 = vld [vmem:[%s6931_s7 + $0x2dc] sm:$0xf]  ;;  %v3801_v54 = vld [vmem:[%s6931_s7 + $0x2f4] sm:$0xf0] }
 0x144   :  { %1034 = vmatpush.bf16.msrb.mxu1 %v3096_v62  ;;  %v3435_v62 = vld [vmem:[%s6931_s7] sm:$0xf] }
 0x145   :  { %1048 = vmatpush.bf16.msrb.mxu2 %v3224_v3  ;;  %v3716_v3 = vor.u32 %v4527_v60, %v3715_v59  ;;  %v3436_v4 = vor.u32 %v4457_v63, %v3435_v62  ;;  %v4468_v59 = vld [vmem:[%s6931_s7 + $0x74] sm:$0xf]  ;;  %v3493_v60 = vld [vmem:[%s6931_s7 + $0x8c] sm:$0xf0]  ;;  %v4081_v63 = vld [vmem:[%s6931_s7 + $0x524] sm:$0xf0] }
 0x146   :  { %1022 = vmatpush.bf16.msrb.mxu0 %v3316_v7  ;;  %v3995_v7 = vld [vmem:[%s6931_s7 + $0x460] sm:$0xf]  ;;  %v3496_v62 = vor.u32 %v4468_v59, %v3493_v60  ;;  %v4249_v59 = vld [vmem:[%s6931_s7 + $0x674] sm:$0xf0] }
 0x147   :  { %1064 = vmatpush.bf16.msrb.mxu3 %v3320_v10  ;;  %v3996_v9 = vor.u32 %v4597_v8, %v3995_v7  ;;  %v4496_v10 = vld [vmem:[%s6931_s7 + $0x154] sm:$0xf]  ;;  %v3773_v7 = vld [vmem:[%s6931_s7 + $0x2bc] sm:$0xf0] }
 0x148   :  { %1035 = vmatpush.bf16.msrb.mxu1 %v3080_v12 }
 0x149   :  { %1049 = vmatpush.bf16.msrb.mxu2 %v3208_v15  ;;  %1023 = vmatmul.bf16.vlgmr.msrb.gmra.mxu0 %v5370_v5  ;;  %v4303_v15 = vld [vmem:[%s6931_s7 + $0x6c8] sm:$0xf] }
 0x14a   :  { %2507 = vmatpush.bf16.msra.mxu0 %v3632_v11  ;;  %1065 = vmatmul.bf16.vlgmr.msrb.gmra.mxu3 %v5370_v5  ;;  %v3547_v5 = vld [vmem:[%s6931_s7 + $0xe0] sm:$0xf]  ;;  %v3605_v11 = vld [vmem:[%s6931_s7 + $0x16c] sm:$0xf0]  ;;  %v4304_v20 = vor.u32 %v4674_v17, %v4303_v15  ;;  %v4639_v15 = vld [vmem:[%s6931_s7 + $0x5c8] sm:$0xf0] }
 0x14b   :  { %v3548_v42 = vor.u32 %v4485_v36, %v3547_v5  ;;  %v3608_v12 = vor.u32 %v4496_v10, %v3605_v11  ;;  %v4482_v36 = vld [vmem:[%s6931_s7 + $0xe4] sm:$0xf]  ;;  %v3465_v10 = vld [vmem:[%s6931_s7 + $0x54] sm:$0xf0]  ;;  %v4608_v11 = vld [vmem:[%s6931_s7 + $0x4d4] sm:$0xf]  ;;  %v4164_v17 = vor.u32 %v4639_v15, %v4163_v14 }
 0x14c   :  { %1036 = vmatpush.bf16.msrb.mxu1 %v3064_v25  ;;  %2549 = vmatpush.bf16.msra.mxu3 %v4304_v20  ;;  %v3659_v25 = vld [vmem:[%s6931_s7 + $0x1c0] sm:$0xf]  ;;  %v3748_v20 = vor.u32 %v4531_v18, %v3745_v19  ;;  %v4643_v14 = vld [vmem:[%s6931_s7 + $0x5ec] sm:$0xf]  ;;  %v4193_v15 = vld [vmem:[%s6931_s7 + $0x604] sm:$0xf0] }
 0x14d   :  { %1050 = vmatpush.bf16.msrb.mxu2 %v3192_v28  ;;  %v3660_v28 = vor.u32 %v4513_v26, %v3659_v25  ;;  %v4025_v25 = vld [vmem:[%s6931_s7 + $0x4b4] sm:$0xf0]  ;;  %v4196_v18 = vor.u32 %v4643_v14, %v4193_v15  ;;  %v3527_v14 = vld [vmem:[%s6931_s7 + $0xb0] sm:$0xf]  ;;  %v4479_v15 = vld [vmem:[%s6931_s7 + $0xc8] sm:$0xf0] }
 0x14e   :  { %2508 = vmatpush.bf16.msra.mxu0 %v3604_v22  ;;  %v4489_v22 = vld [vmem:[%s6931_s7 + $0x11c] sm:$0xf]  ;;  %v4135_v26 = vld [vmem:[%s6931_s7 + $0x578] sm:$0xf] }
 0x14f   :  { %1037 = vmatmul.bf16.vlgmr.msrb.gmra.mxu1 %v5325_v41  ;;  %v4478_v41 = vld [vmem:[%s6931_s7 + $0xc0] sm:$0xf0]  ;;  %v3580_v24 = vor.u32 %v4489_v22, %v3577_v23  ;;  %v3437_v22 = vld [vmem:[%s6931_s7 + $0x1c] sm:$0xf0]  ;;  %v4601_v23 = vld [vmem:[%s6931_s7 + $0x49c] sm:$0xf] }
 0x150   :  { %2521 = vmatpush.bf16.msra.mxu1 %v3856_v29  ;;  %1051 = vmatmul.bf16.vlgmr.msrb.gmra.mxu2 %v5362_v1  ;;  %v4024_v1 = vor.u32 %v4604_v44, %v4023_v43  ;;  %v3520_v49 = vor.u32 %v4478_v41, %v3519_v45  ;;  %v4667_v29 = vld [vmem:[%s6931_s7 + $0x6a8] sm:$0xf0]  ;;  %v4552_v43 = vld [vmem:[%s6931_s7 + $0x314] sm:$0xf]  ;;  %v3829_v44 = vld [vmem:[%s6931_s7 + $0x32c] sm:$0xf0] }
 0x151   :  { %2535 = vmatpush.bf16.msra.mxu2 %v4080_v32  ;;  %v4276_v31 = vor.u32 %v4667_v29, %v4275_v27  ;;  %v3857_v32 = vld [vmem:[%s6931_s7 + $0x364] sm:$0xf0]  ;;  %v3832_v45 = vor.u32 %v4552_v43, %v3829_v44  ;;  %v3911_v41 = vld [vmem:[%s6931_s7 + $0x3b8] sm:$0xf]  ;;  %v4632_v27 = vld [vmem:[%s6931_s7 + $0x590] sm:$0xf0] }
 0x152   :  { %2509 = vmatpush.bf16.msra.mxu0 %v3576_v33  ;;  %v3939_v33 = vld [vmem:[%s6931_s7 + $0x3f0] sm:$0xf]  ;;  %v3860_v35 = vor.u32 %v4559_v30, %v3857_v32  ;;  %v4136_v29 = vor.u32 %v4632_v27, %v4135_v26  ;;  %v4524_v30 = vld [vmem:[%s6931_s7 + $0x234] sm:$0xf]  ;;  %v4671_v43 = vld [vmem:[%s6931_s7 + $0x6cc] sm:$0xf] }
 0x153   :  { %v3940_v5 = vor.u32 %v4583_v34, %v3939_v33  ;;  %2550 = vmatpush.bf16.msra.mxu3 %v4276_v31  ;;  %v3717_v31 = vld [vmem:[%s6931_s7 + $0x24c] sm:$0xf0]  ;;  %v4594_v33 = vld [vmem:[%s6931_s7 + $0x464] sm:$0xf]  ;;  %v3997_v34 = vld [vmem:[%s6931_s7 + $0x47c] sm:$0xf0] }
 0x154   :  { %2522 = vmatpush.bf16.msra.mxu1 %v3828_v37  ;;  %v3549_v37 = vld [vmem:[%s6931_s7 + $0xfc] sm:$0xf0]  ;;  %v3720_v32 = vor.u32 %v4524_v30, %v3717_v31  ;;  %v4305_v44 = vld [vmem:[%s6931_s7 + $0x6e4] sm:$0xf0]  ;;  %v3639_v30 = vld [vmem:[%s6931_s7 + $0x190] sm:$0xf] }
 0x155   :  { %2536 = vmatpush.bf16.msra.mxu2 %v4052_v40  ;;  %v3552_v38 = vor.u32 %v4482_v36, %v3549_v37  ;;  %v4660_v40 = vld [vmem:[%s6931_s7 + $0x670] sm:$0xf0]  ;;  %v4625_v36 = vld [vmem:[%s6931_s7 + $0x558] sm:$0xf0]  ;;  %v4507_v31 = vld [vmem:[%s6931_s7 + $0x1a8] sm:$0xf0] }
 0x156   :  { %2510 = vmatpush.bf16.msra.mxu0 %v3548_v42  ;;  %v4248_v42 = vor.u32 %v4660_v40, %v4247_v39  ;;  %v3689_v39 = vld [vmem:[%s6931_s7 + $0x214] sm:$0xf0] }
 0x158   :  { %2523 = vmatpush.bf16.msra.mxu1 %v3800_v46  ;;  %v4576_v46 = vld [vmem:[%s6931_s7 + $0x3d0] sm:$0xf0]  ;;  %2551 = vmatpush.bf16.msra.mxu3 %v4248_v42 }
 0x159   :  { %2537 = vmatpush.bf16.msra.mxu2 %v4024_v1  ;;  %v3912_v47 = vor.u32 %v4576_v46, %v3911_v41  ;;  %v3521_v1 = vld [vmem:[%s6931_s7 + $0xc4] sm:$0xf0]  ;;  %v4587_v41 = vld [vmem:[%s6931_s7 + $0x42c] sm:$0xf] }
 0x15a   :  { %2511 = vmatpush.bf16.msra.mxu0 %v3520_v49  ;;  %v3524_v49 = vor.u32 %v4475_v48, %v3521_v1  ;;  %v3969_v46 = vld [vmem:[%s6931_s7 + $0x444] sm:$0xf0]  ;;  %v4510_v48 = vld [vmem:[%s6931_s7 + $0x1c4] sm:$0xf]  ;;  %v3661_v1 = vld [vmem:[%s6931_s7 + $0x1dc] sm:$0xf0] }
 0x15c   :  { %2524 = vmatpush.bf16.msra.mxu1 %v3772_v52  ;;  %v4220_v52 = vor.u32 %v4653_v51, %v4219_v50  ;;  %v3664_v50 = vor.u32 %v4510_v48, %v3661_v1  ;;  %v4277_v51 = vld [vmem:[%s6931_s7 + $0x6ac] sm:$0xf0] }
 0x15d   :  { %2538 = vmatpush.bf16.msra.mxu2 %v3996_v9  ;;  %v4461_v9 = vld [vmem:[%s6931_s7 + $0x3c] sm:$0xf] }
 0x15e   :  { %2512 = vmatpush.bf16.msra.mxu0 %v3492_v55  ;;  %v3804_v55 = vor.u32 %v4545_v53, %v3801_v54  ;;  %2552 = vmatpush.bf16.msra.mxu3 %v4220_v52  ;;  %v4580_v53 = vld [vmem:[%s6931_s7 + $0x3f4] sm:$0xf]  ;;  %v3941_v54 = vld [vmem:[%s6931_s7 + $0x40c] sm:$0xf0] }
 0x160   :  { %2525 = vmatpush.bf16.msra.mxu1 %v3744_v58  ;;  %v3884_v58 = vor.u32 %v4569_v57, %v3883_v56  ;;  %v3944_v57 = vor.u32 %v4580_v53, %v3941_v54  ;;  %v3583_v53 = vld [vmem:[%s6931_s7 + $0x120] sm:$0xf]  ;;  %v4493_v54 = vld [vmem:[%s6931_s7 + $0x138] sm:$0xf0] }
 0x161   :  { %2539 = vmatpush.bf16.msra.mxu2 %v3968_v21  ;;  %v4454_v21 = vld [vmem:[%s6931_s7 + $0x4] sm:$0xf] }
 0x162   :  { %2513 = vmatpush.bf16.msra.mxu0 %v3464_v61  ;;  %v4615_v61 = vld [vmem:[%s6931_s7 + $0x50c] sm:$0xf] }
 0x164   :  { %2526 = vmatpush.bf16.msra.mxu1 %v3716_v3  ;;  %v4084_v3 = vor.u32 %v4615_v61, %v4081_v63  ;;  %v4573_v63 = vld [vmem:[%s6931_s7 + $0x3bc] sm:$0xf] }
 0x165   :  { %2540 = vmatpush.bf16.msra.mxu2 %v3940_v5  ;;  %v4107_v5 = vld [vmem:[%s6931_s7 + $0x540] sm:$0xf] }
 0x166   :  { %2514 = vmatpush.bf16.msra.mxu0 %v3436_v4  ;;  %v4192_v4 = vor.u32 %v4646_v2, %v4191_v0  ;;  %v4108_v37 = vor.u32 %v4625_v36, %v4107_v5  ;;  %v3913_v0 = vld [vmem:[%s6931_s7 + $0x3d4] sm:$0xf0] }
 0x167   :  { %v3916_v2 = vor.u32 %v4573_v63, %v3913_v0  ;;  %v3584_v63 = vor.u32 %v4493_v54, %v3583_v53  ;;  %v4504_v54 = vld [vmem:[%s6931_s7 + $0x194] sm:$0xf] }
 0x168   :  { %2527 = vmatpush.bf16.msra.mxu1 %v3688_v16  ;;  %2553 = vmatpush.bf16.msra.mxu3 %v4192_v4  ;;  %v4056_v16 = vor.u32 %v4608_v11, %v4053_v13  ;;  %v4221_v4 = vld [vmem:[%s6931_s7 + $0x63c] sm:$0xf0] }
 0x169   :  { %2541 = vmatpush.bf16.msra.mxu2 %v3912_v47  ;;  %v3972_v47 = vor.u32 %v4587_v41, %v3969_v46  ;;  %v4622_v41 = vld [vmem:[%s6931_s7 + $0x544] sm:$0xf]  ;;  %v4109_v46 = vld [vmem:[%s6931_s7 + $0x55c] sm:$0xf0] }
 0x16a   :  { %2563 = vmatpush.bf16.msrb.mxu0 %v3636_v6  ;;  %v4538_v6 = vld [vmem:[%s6931_s7 + $0x2a4] sm:$0xf]  ;;  %v4112_v48 = vor.u32 %v4622_v41, %v4109_v46  ;;  %v4535_v41 = vld [vmem:[%s6931_s7 + $0x288] sm:$0xf0] }
 0x16b   :  { %v3776_v8 = vor.u32 %v4538_v6, %v3773_v7 }
 0x16c   :  { %2528 = vmatpush.bf16.msra.mxu1 %v3660_v28  ;;  %2554 = vmatpush.bf16.msra.mxu3 %v4164_v17  ;;  %v4028_v28 = vor.u32 %v4601_v23, %v4025_v25 }
 0x16d   :  { %2542 = vmatpush.bf16.msra.mxu2 %v3884_v58  ;;  %v4657_v58 = vld [vmem:[%s6931_s7 + $0x65c] sm:$0xf] }
 0x16e   :  { %2564 = vmatpush.bf16.msrb.mxu0 %v3608_v12  ;;  %v3468_v12 = vor.u32 %v4461_v9, %v3465_v10  ;;  %v4252_v61 = vor.u32 %v4657_v58, %v4249_v59  ;;  %v4566_v9 = vld [vmem:[%s6931_s7 + $0x384] sm:$0xf]  ;;  %v3885_v10 = vld [vmem:[%s6931_s7 + $0x39c] sm:$0xf0] }
 0x170   :  { %2577 = vmatpush.bf16.msrb.mxu1 %v3860_v35  ;;  %2555 = vmatpush.bf16.msra.mxu3 %v4136_v29  ;;  %v4000_v35 = vor.u32 %v4594_v33, %v3997_v34  ;;  %v4137_v33 = vld [vmem:[%s6931_s7 + $0x594] sm:$0xf0] }
 0x171   :  { %2591 = vmatpush.bf16.msrb.mxu2 %v4084_v3  ;;  %v4650_v3 = vld [vmem:[%s6931_s7 + $0x624] sm:$0xf] }
 0x172   :  { %2565 = vmatpush.bf16.msrb.mxu0 %v3580_v24  ;;  %v3440_v24 = vor.u32 %v4454_v21, %v3437_v22  ;;  %v4224_v7 = vor.u32 %v4650_v3, %v4221_v4  ;;  %v4636_v21 = vld [vmem:[%s6931_s7 + $0x5b4] sm:$0xf]  ;;  %v4165_v22 = vld [vmem:[%s6931_s7 + $0x5cc] sm:$0xf0]  ;;  %v4486_v3 = vld [vmem:[%s6931_s7 + $0x100] sm:$0xf0] }
 0x173   :  { %v4168_v25 = vor.u32 %v4636_v21, %v4165_v22  ;;  %v3528_v22 = vor.u32 %v4479_v15, %v3527_v14  ;;  %v4311_v14 = vld [vmem:[%s6931_s7 + $0x6d0] sm:$0xf]  ;;  %v4675_v15 = vld [vmem:[%s6931_s7 + $0x6e8] sm:$0xf0] }
 0x174   :  { %2578 = vmatpush.bf16.msrb.mxu1 %v3832_v45  ;;  %2556 = vmatpush.bf16.msra.mxu3 %v4108_v37  ;;  %v4308_v45 = vor.u32 %v4671_v43, %v4305_v44  ;;  %v4500_v43 = vld [vmem:[%s6931_s7 + $0x170] sm:$0xf0] }
 0x175   :  { %2592 = vmatpush.bf16.msrb.mxu2 %v4056_v16 }
 0x176   :  { %2566 = vmatpush.bf16.msrb.mxu0 %v3552_v38  ;;  %v4517_v38 = vld [vmem:[%s6931_s7 + $0x1fc] sm:$0xf] }
 0x177   :  { %v3692_v42 = vor.u32 %v4517_v38, %v3689_v39  ;;  %v3640_v39 = vor.u32 %v4507_v31, %v3639_v30  ;;  %v4542_v30 = vld [vmem:[%s6931_s7 + $0x2c0] sm:$0xf0] }
 0x178   :  { %2579 = vmatpush.bf16.msrb.mxu1 %v3804_v55  ;;  %2605 = vmatpush.bf16.msrb.mxu3 %v4308_v45 }
 0x179   :  { %2593 = vmatpush.bf16.msrb.mxu2 %v4028_v28 }
 0x17a   :  { %2567 = vmatpush.bf16.msrb.mxu0 %v3524_v49  ;;  %v4664_v49 = vld [vmem:[%s6931_s7 + $0x694] sm:$0xf] }
 0x17b   :  { %v4280_v52 = vor.u32 %v4664_v49, %v4277_v51 }
 0x17c   :  { %2580 = vmatpush.bf16.msrb.mxu1 %v3776_v8 }
 0x17d   :  { %2594 = vmatpush.bf16.msrb.mxu2 %v4000_v35  ;;  %2606 = vmatpush.bf16.msrb.mxu3 %v4280_v52 }
 0x17e   :  { %2568 = vmatpush.bf16.msrb.mxu0 %v3496_v62  ;;  %v5865_v62 = vld [vmem:[%s6930_s6] sm:$0xf] }
 0x17f   :  { %v415_v6 = vperm.slane %v5865_v62, 0  ;;  %v416_v26 = vperm.slane %v5865_v62, 1 }
 0x180   :  { %2581 = vmatpush.bf16.msrb.mxu1 %v3748_v20 }
 0x181   :  { %2595 = vmatpush.bf16.msrb.mxu2 %v3972_v47  ;;  %2607 = vmatpush.bf16.msrb.mxu3 %v4252_v61  ;;  %v417_v47 = vperm.slane %v5865_v62, 2 }
 0x182   :  { %2569 = vmatpush.bf16.msrb.mxu0 %v3468_v12  ;;  %v3888_v12 = vor.u32 %v4566_v9, %v3885_v10 }
 0x184   :  { %2582 = vmatpush.bf16.msrb.mxu1 %v3720_v32  ;;  %v4629_v32 = vld [vmem:[%s6931_s7 + $0x57c] sm:$0xf] }
 0x185   :  { %2596 = vmatpush.bf16.msrb.mxu2 %v3944_v57  ;;  %2608 = vmatpush.bf16.msrb.mxu3 %v4224_v7  ;;  %v4140_v36 = vor.u32 %v4629_v32, %v4137_v33  ;;  %v4563_v57 = vld [vmem:[%s6931_s7 + $0x368] sm:$0xf0]  ;;  %v3835_v7 = vld [vmem:[%s6931_s7 + $0x318] sm:$0xf]  ;;  %v418_v32 = vperm.slane %v5865_v62, 3 }
 0x186   :  { %2570 = vmatpush.bf16.msrb.mxu0 %v3440_v24  ;;  %v4465_v62 = vld [vmem:[%s6931_s7 + $0x58] sm:$0xf0] }
 0x188   :  { %2583 = vmatpush.bf16.msrb.mxu1 %v3692_v42  ;;  %v3611_v42 = vld [vmem:[%s6931_s7 + $0x158] sm:$0xf] }
 0x189   :  { %2597 = vmatpush.bf16.msrb.mxu2 %v3916_v2  ;;  %2609 = vmatpush.bf16.msrb.mxu3 %v4196_v18  ;;  %v3612_v51 = vor.u32 %v4500_v43, %v3611_v42  ;;  %v3555_v2 = vld [vmem:[%s6931_s7 + $0xe8] sm:$0xf]  ;;  %v4549_v18 = vld [vmem:[%s6931_s7 + $0x2f8] sm:$0xf0]  ;;  %v4059_v42 = vld [vmem:[%s6931_s7 + $0x4d8] sm:$0xf] }
 0x18a   :  { %v4612_v43 = vld [vmem:[%s6931_s7 + $0x4f0] sm:$0xf0] }
 0x18c   :  { %2584 = vmatpush.bf16.msrb.mxu1 %v3664_v50 }
 0x18d   :  { %2598 = vmatpush.bf16.msrb.mxu2 %v3888_v12  ;;  %2610 = vmatpush.bf16.msrb.mxu3 %v4168_v25 }
 0x191   :  { %2611 = vmatpush.bf16.msrb.mxu3 %v4140_v36 }
 0x195   :  { %2612 = vmatpush.bf16.msrb.mxu3 %v4112_v48  ;;  %v4060_v48 = vor.u32 %v4612_v43, %v4059_v42  ;;  %v4255_v43 = vld [vmem:[%s6931_s7 + $0x660] sm:$0xf] }
 0x1a6   :  { %v912_v40 = vpop.f32.mrf.mxu0 }
 0x1a7   :  { %v913_v16 = vadd.f32 %v912_v40, %v415_v6 }
 0x1ac   :  { %v926_v55 = vpop.f32.mrf.mxu1  ;;  %v954_v56 = vpop.f32.mrf.mxu3 }
 0x1ad   :  { %v927_v19 = vadd.f32 %v926_v55, %v913_v16  ;;  %v955_v37 = vadd.f32 %v954_v56, %v416_v26  ;;  %v3863_v56 = vld [vmem:[%s6931_s7 + $0x350] sm:$0xf] }
 0x1ae   :  { %v914_v60 = vpop.f32.mrf.mxu0  ;;  %v3864_v0 = vor.u32 %v4563_v57, %v3863_v56  ;;  %v3723_v57 = vld [vmem:[%s6931_s7 + $0x238] sm:$0xf] }
 0x1af   :  { %v915_v20 = vadd.f32 %v914_v60, %v415_v6 }
 0x1b3   :  { %v940_v8 = vpop.f32.mrf.mxu2 }
 0x1b4   :  { %v928_v11 = vpop.f32.mrf.mxu1  ;;  %v956_v13 = vpop.f32.mrf.mxu3  ;;  %v941_v23 = vadd.f32 %v940_v8, %v927_v19  ;;  %v4556_v8 = vld [vmem:[%s6931_s7 + $0x330] sm:$0xf0] }
 0x1b5   :  { %v929_v24 = vadd.f32 %v928_v11, %v915_v20  ;;  %v957_v44 = vadd.f32 %v956_v13, %v416_v26  ;;  %v3556_v11 = vor.u32 %v4486_v3, %v3555_v2  ;;  %v3836_v13 = vor.u32 %v4556_v8, %v3835_v7  ;;  %v4472_v26 = vld [vmem:[%s6931_s7 + $0x90] sm:$0xf0]  ;;  %v4003_v3 = vld [vmem:[%s6931_s7 + $0x468] sm:$0xf] }
 0x1b6   :  { %v968_v17 = vpop.f32.mrf.mxu0  ;;  %v1071_v34 = vmax.f32 %v941_v23, 0.0  ;;  %v3499_v23 = vld [vmem:[%s6931_s7 + $0x78] sm:$0xf] }
 0x1b7   :  { %v969_v45 = vadd.f32 %v968_v17, %v955_v37  ;;  %v3807_v17 = vld [vmem:[%s6931_s7 + $0x2e0] sm:$0xf] }
 0x1b8   :  { %v3808_v25 = vor.u32 %v4549_v18, %v3807_v17  ;;  %v3471_v37 = vld [vmem:[%s6931_s7 + $0x40] sm:$0xf] }
 0x1bb   :  { %v942_v27 = vpop.f32.mrf.mxu2 }
 0x1bc   :  { %v943_v28 = vadd.f32 %v942_v27, %v929_v24  ;;  %v982_v29 = vpop.f32.mrf.mxu1  ;;  %v4087_v27 = vld [vmem:[%s6931_s7 + $0x510] sm:$0xf] }
 0x1bd   :  { %v1010_v38 = vpop.f32.mrf.mxu3  ;;  %v983_v1 = vadd.f32 %v982_v29, %v969_v45  ;;  %v3779_v29 = vld [vmem:[%s6931_s7 + $0x2a8] sm:$0xf]  ;;  %v3751_v45 = vld [vmem:[%s6931_s7 + $0x270] sm:$0xf] }
 0x1be   :  { %v1075_v35 = vmax.f32 %v943_v28, 0.0  ;;  %v970_v5 = vpop.f32.mrf.mxu0  ;;  %v4619_v28 = vld [vmem:[%s6931_s7 + $0x528] sm:$0xf0]  ;;  %v3752_v53 = vor.u32 %v4535_v41, %v3751_v45  ;;  %v4553_v41 = vld [vmem:[%s6931_s7 + $0x31c] sm:$0xf] }
 0x1bf   :  { %v971_v49 = vadd.f32 %v970_v5, %v957_v44  ;;  %v1072_v60 = vmax.f32 %v983_v1, 0.0  ;;  %v3500_v5 = vor.u32 %v4472_v26, %v3499_v23  ;;  %v4088_v36 = vor.u32 %v4619_v28, %v4087_v27  ;;  %v3443_v1 = vld [vmem:[%s6931_s7 + $0x8] sm:$0xf]  ;;  %v4514_v28 = vld [vmem:[%s6931_s7 + $0x1e0] sm:$0xf0] }
 0x1c0   :  { %v5911_v40 = vpack.c.bf16 %v1075_v35, %v1071_v34  ;;  %v4312_v23 = vor.u32 %v4675_v15, %v4311_v14  ;;  %v3667_v26 = vld [vmem:[%s6931_s7 + $0x1c8] sm:$0xf]  ;;  %v4462_v14 = vld [vmem:[%s6931_s7 + $0x44] sm:$0xf]  ;;  %v3473_v15 = vld [vmem:[%s6931_s7 + $0x5c] sm:$0xf0] }
 0x1c2   :  { %2515 = vmatmul.bf16.vlgmr.msra.gmra.mxu0 %v5911_v40 }
 0x1c3   :  { %2619 = vmatpush.bf16.msra.mxu0 %v3640_v39  ;;  %v996_v50 = vpop.f32.mrf.mxu2  ;;  %v3780_v39 = vor.u32 %v4542_v30, %v3779_v29  ;;  %v4283_v29 = vld [vmem:[%s6931_s7 + $0x698] sm:$0xf]  ;;  %v4668_v30 = vld [vmem:[%s6931_s7 + $0x6b0] sm:$0xf0] }
 0x1c4   :  { %v984_v52 = vpop.f32.mrf.mxu1  ;;  %v997_v58 = vadd.f32 %v996_v50, %v417_v47  ;;  %v4458_v50 = vld [vmem:[%s6931_s7 + $0x20] sm:$0xf0] }
 0x1c5   :  { %v985_v55 = vadd.f32 %v984_v52, %v971_v49  ;;  %v1012_v6 = vpop.f32.mrf.mxu3  ;;  %v4605_v52 = vld [vmem:[%s6931_s7 + $0x4b8] sm:$0xf0] }
 0x1c6   :  { %v1024_v59 = vpop.f32.mrf.mxu0  ;;  %v1011_v9 = vadd.f32 %v1010_v38, %v997_v58  ;;  %v4528_v58 = vld [vmem:[%s6931_s7 + $0x250] sm:$0xf0] }
 0x1c7   :  { %v1076_v61 = vmax.f32 %v985_v55, 0.0  ;;  %2620 = vmatpush.bf16.msra.mxu0 %v3612_v51  ;;  %v4031_v51 = vld [vmem:[%s6931_s7 + $0x4a0] sm:$0xf]  ;;  %v3641_v55 = vld [vmem:[%s6931_s7 + $0x1ac] sm:$0xf0]  ;;  %v3724_v8 = vor.u32 %v4528_v58, %v3723_v57 }
 0x1c8   :  { %v1025_v19 = vadd.f32 %v1024_v59, %v1011_v9  ;;  %v3644_v2 = vor.u32 %v4504_v54, %v3641_v55  ;;  %v4497_v9 = vld [vmem:[%s6931_s7 + $0x15c] sm:$0xf]  ;;  %v4654_v54 = vld [vmem:[%s6931_s7 + $0x640] sm:$0xf0]  ;;  %v3809_v57 = vld [vmem:[%s6931_s7 + $0x2fc] sm:$0xf0] }
 0x1c9   :  { %v5945_v4 = vpack.c.bf16 %v1076_v61, %v1072_v60  ;;  %v3444_v60 = vor.u32 %v4458_v50, %v3443_v1  ;;  %v4032_v61 = vor.u32 %v4605_v52, %v4031_v51  ;;  %v4577_v1 = vld [vmem:[%s6931_s7 + $0x3d8] sm:$0xf0]  ;;  %v4476_v50 = vld [vmem:[%s6931_s7 + $0xb4] sm:$0xf]  ;;  %v3529_v51 = vld [vmem:[%s6931_s7 + $0xcc] sm:$0xf0] }
 0x1ca   :  { %v1073_v31 = vmax.f32 %v1025_v19, 0.0  ;;  %v3532_v58 = vor.u32 %v4476_v50, %v3529_v51  ;;  %v3697_v50 = vld [vmem:[%s6931_s7 + $0x21c] sm:$0xf0] }
 0x1cb   :  { %2621 = vmatpush.bf16.msra.mxu0 %v3584_v63  ;;  %v998_v10 = vpop.f32.mrf.mxu2  ;;  %2529 = vmatmul.bf16.vlgmr.msra.gmra.mxu1 %v5945_v4 }
 0x1cc   :  { %v999_v12 = vadd.f32 %v998_v10, %v417_v47  ;;  %2633 = vmatpush.bf16.msra.mxu1 %v3864_v0  ;;  %v1038_v16 = vpop.f32.mrf.mxu1  ;;  %v3472_v47 = vor.u32 %v4465_v62, %v3471_v37  ;;  %v3613_v10 = vld [vmem:[%s6931_s7 + $0x174] sm:$0xf0]  ;;  %v4284_v37 = vor.u32 %v4668_v30, %v4283_v29  ;;  %v3557_v62 = vld [vmem:[%s6931_s7 + $0x104] sm:$0xf0]  ;;  %v4602_v29 = vld [vmem:[%s6931_s7 + $0x4a4] sm:$0xf] }
 0x1cd   :  { %v1066_v34 = vpop.f32.mrf.mxu3  ;;  %v1039_v44 = vadd.f32 %v1038_v16, %v418_v32  ;;  %v3616_v19 = vor.u32 %v4497_v9, %v3613_v10  ;;  %v4647_v9 = vld [vmem:[%s6931_s7 + $0x608] sm:$0xf0]  ;;  %v4033_v30 = vld [vmem:[%s6931_s7 + $0x4bc] sm:$0xf0] }
 0x1ce   :  { %v1013_v20 = vadd.f32 %v1012_v6, %v999_v12  ;;  %v1026_v21 = vpop.f32.mrf.mxu0  ;;  %v4598_v6 = vld [vmem:[%s6931_s7 + $0x480] sm:$0xf0]  ;;  %v4539_v10 = vld [vmem:[%s6931_s7 + $0x2ac] sm:$0xf] }
 0x1cf   :  { %2622 = vmatpush.bf16.msra.mxu0 %v3556_v11  ;;  %v3695_v11 = vld [vmem:[%s6931_s7 + $0x200] sm:$0xf]  ;;  %v4004_v16 = vor.u32 %v4598_v6, %v4003_v3  ;;  %v4089_v3 = vld [vmem:[%s6931_s7 + $0x52c] sm:$0xf0] }
 0x1d0   :  { %v1027_v24 = vadd.f32 %v1026_v21, %v1013_v20  ;;  %2634 = vmatpush.bf16.msra.mxu1 %v3836_v13  ;;  %v4521_v13 = vld [vmem:[%s6931_s7 + $0x218] sm:$0xf0]  ;;  %v3975_v20 = vld [vmem:[%s6931_s7 + $0x430] sm:$0xf]  ;;  %v4591_v21 = vld [vmem:[%s6931_s7 + $0x448] sm:$0xf0] }
 0x1d2   :  { %v1077_v33 = vmax.f32 %v1027_v24, 0.0  ;;  %2571 = vmatmul.bf16.vlgmr.msrb.gmra.mxu0 %v5911_v40  ;;  %v4490_v24 = vld [vmem:[%s6931_s7 + $0x124] sm:$0xf] }
 0x1d3   :  { %2623 = vmatpush.bf16.msra.mxu0 %v3528_v22  ;;  %v1052_v35 = vpop.f32.mrf.mxu2  ;;  %v3696_v22 = vor.u32 %v4521_v13, %v3695_v11  ;;  %v3781_v11 = vld [vmem:[%s6931_s7 + $0x2c4] sm:$0xf0] }
 0x1d4   :  { %v5989_v38 = vpack.c.bf16 %v1077_v33, %v1073_v31  ;;  %2635 = vmatpush.bf16.msra.mxu1 %v3808_v25  ;;  %v1040_v46 = vpop.f32.mrf.mxu1  ;;  %v1053_v49 = vadd.f32 %v1052_v35, %v1039_v44  ;;  %v3585_v25 = vld [vmem:[%s6931_s7 + $0x13c] sm:$0xf0]  ;;  %v3976_v31 = vor.u32 %v4591_v21, %v3975_v20  ;;  %v3865_v33 = vld [vmem:[%s6931_s7 + $0x36c] sm:$0xf0]  ;;  %v3947_v35 = vld [vmem:[%s6931_s7 + $0x3f8] sm:$0xf] }
 0x1d5   :  { %v1041_v56 = vadd.f32 %v1040_v46, %v418_v32  ;;  %v1068_v7 = vpop.f32.mrf.mxu3  ;;  %v4560_v32 = vld [vmem:[%s6931_s7 + $0x354] sm:$0xf]  ;;  %v4661_v44 = vld [vmem:[%s6931_s7 + $0x678] sm:$0xf0]  ;;  %v3837_v46 = vld [vmem:[%s6931_s7 + $0x334] sm:$0xf0] }
 0x1d6   :  { %2543 = vmatmul.bf16.vlgmr.msra.gmra.mxu2 %v5989_v38  ;;  %v1067_v63 = vadd.f32 %v1066_v34, %v1053_v49  ;;  %v3588_v34 = vor.u32 %v4490_v24, %v3585_v25  ;;  %v3868_v42 = vor.u32 %v4560_v32, %v3865_v33  ;;  %v4256_v49 = vor.u32 %v4661_v44, %v4255_v43  ;;  %v4171_v20 = vld [vmem:[%s6931_s7 + $0x5b8] sm:$0xf]  ;;  %v4640_v21 = vld [vmem:[%s6931_s7 + $0x5d0] sm:$0xf0]  ;;  %v4143_v33 = vld [vmem:[%s6931_s7 + $0x580] sm:$0xf] }
 0x1d7   :  { %2624 = vmatpush.bf16.msra.mxu0 %v3500_v5  ;;  %2647 = vmatpush.bf16.msra.mxu2 %v4088_v36  ;;  %v4584_v5 = vld [vmem:[%s6931_s7 + $0x410] sm:$0xf0]  ;;  %v3668_v36 = vor.u32 %v4514_v28, %v3667_v26  ;;  %v3840_v52 = vor.u32 %v4553_v41, %v3837_v46  ;;  %v3476_v24 = vor.u32 %v4462_v14, %v3473_v15  ;;  %v4455_v26 = vld [vmem:[%s6931_s7 + $0xc] sm:$0xf]  ;;  %v3445_v28 = vld [vmem:[%s6931_s7 + $0x24] sm:$0xf0] }
 0x1d8   :  { %2636 = vmatpush.bf16.msra.mxu1 %v3780_v39  ;;  %v1074_v17 = vmax.f32 %v1067_v63, 0.0  ;;  %v4483_v39 = vld [vmem:[%s6931_s7 + $0xec] sm:$0xf]  ;;  %v3948_v45 = vor.u32 %v4584_v5, %v3947_v35  ;;  %v4508_v35 = vld [vmem:[%s6931_s7 + $0x1b0] sm:$0xf0] }
 0x1d9   :  { %v4633_v5 = vld [vmem:[%s6931_s7 + $0x598] sm:$0xf0]  ;;  %v4595_v43 = vld [vmem:[%s6931_s7 + $0x46c] sm:$0xf]  ;;  %v4005_v44 = vld [vmem:[%s6931_s7 + $0x484] sm:$0xf0] }
 0x1da   :  { %v4115_v46 = vld [vmem:[%s6931_s7 + $0x548] sm:$0xf]  ;;  %v4008_v51 = vor.u32 %v4595_v43, %v4005_v44  ;;  %v4487_v14 = vld [vmem:[%s6931_s7 + $0x108] sm:$0xf0] }
 0x1db   :  { %2625 = vmatpush.bf16.msra.mxu0 %v3472_v47  ;;  %2648 = vmatpush.bf16.msra.mxu2 %v4060_v48  ;;  %v1054_v59 = vpop.f32.mrf.mxu2  ;;  %v3560_v47 = vor.u32 %v4483_v39, %v3557_v62  ;;  %v3919_v48 = vld [vmem:[%s6931_s7 + $0x3c0] sm:$0xf]  ;;  %v3448_v39 = vor.u32 %v4455_v26, %v3445_v28  ;;  %v4036_v62 = vor.u32 %v4602_v29, %v4033_v30  ;;  %v4480_v26 = vld [vmem:[%s6931_s7 + $0xd0] sm:$0xf0]  ;;  %v4651_v30 = vld [vmem:[%s6931_s7 + $0x62c] sm:$0xf] }
 0x1dc   :  { %v1055_v0 = vadd.f32 %v1054_v59, %v1041_v56  ;;  %2585 = vmatmul.bf16.vlgmr.msrb.gmra.mxu1 %v5945_v4  ;;  %v3920_v55 = vor.u32 %v4577_v1, %v3919_v48  ;;  %v4546_v56 = vld [vmem:[%s6931_s7 + $0x2e4] sm:$0xf]  ;;  %v3891_v59 = vld [vmem:[%s6931_s7 + $0x388] sm:$0xf]  ;;  %v4501_v48 = vld [vmem:[%s6931_s7 + $0x178] sm:$0xf0] }
 0x1dd   :  { %2637 = vmatpush.bf16.msra.mxu1 %v3752_v53  ;;  %v4227_v53 = vld [vmem:[%s6931_s7 + $0x628] sm:$0xf]  ;;  %v3812_v6 = vor.u32 %v4546_v56, %v3809_v57  ;;  %v4626_v1 = vld [vmem:[%s6931_s7 + $0x560] sm:$0xf0]  ;;  %v3977_v56 = vld [vmem:[%s6931_s7 + $0x44c] sm:$0xf0] }
 0x1de   :  { %v1069_v12 = vadd.f32 %v1068_v7, %v1055_v0  ;;  %v4228_v63 = vor.u32 %v4654_v54, %v4227_v53  ;;  %v3501_v0 = vld [vmem:[%s6931_s7 + $0x94] sm:$0xf0]  ;;  %v4199_v7 = vld [vmem:[%s6931_s7 + $0x5f0] sm:$0xf]  ;;  %v4116_v57 = vor.u32 %v4626_v1, %v4115_v46 }
 0x1df   :  { %2626 = vmatpush.bf16.msra.mxu0 %v3444_v60  ;;  %2649 = vmatpush.bf16.msra.mxu2 %v4032_v61  ;;  %v4570_v60 = vld [vmem:[%s6931_s7 + $0x3a0] sm:$0xf0]  ;;  %v4469_v61 = vld [vmem:[%s6931_s7 + $0x7c] sm:$0xf]  ;;  %v4313_v53 = vld [vmem:[%s6931_s7 + $0x6ec] sm:$0xf0] }
 0x1e0   :  { %v1078_v18 = vmax.f32 %v1069_v12, 0.0  ;;  %v3504_v12 = vor.u32 %v4469_v61, %v3501_v0  ;;  %v3669_v0 = vld [vmem:[%s6931_s7 + $0x1e4] sm:$0xf0]  ;;  %v4201_v46 = vld [vmem:[%s6931_s7 + $0x60c] sm:$0xf0] }
 0x1e1   :  { %2638 = vmatpush.bf16.msra.mxu1 %v3724_v8  ;;  %v3892_v8 = vor.u32 %v4570_v60, %v3891_v59  ;;  %v3591_v59 = vld [vmem:[%s6931_s7 + $0x128] sm:$0xf]  ;;  %v4494_v60 = vld [vmem:[%s6931_s7 + $0x140] sm:$0xf0]  ;;  %v3787_v1 = vld [vmem:[%s6931_s7 + $0x2b0] sm:$0xf] }
 0x1e2   :  { %v6071_v27 = vpack.c.bf16 %v1078_v18, %v1074_v17  ;;  %2627 = vmatmul.bf16.vlgmr.msra.gmra.mxu0 %v5911_v40  ;;  %v4061_v17 = vld [vmem:[%s6931_s7 + $0x4f4] sm:$0xf0]  ;;  %v4200_v18 = vor.u32 %v4647_v9, %v4199_v7  ;;  %v3592_v9 = vor.u32 %v4494_v60, %v3591_v59 }
 0x1e3   :  { %2675 = vmatpush.bf16.msrb.mxu0 %v3644_v2  ;;  %2650 = vmatpush.bf16.msra.mxu2 %v4004_v16  ;;  %v4616_v2 = vld [vmem:[%s6931_s7 + $0x514] sm:$0xf]  ;;  %v4609_v16 = vld [vmem:[%s6931_s7 + $0x4dc] sm:$0xf]  ;;  %v3871_v7 = vld [vmem:[%s6931_s7 + $0x358] sm:$0xf] }
 0x1e4   :  { %2557 = vmatmul.bf16.vlgmr.msra.gmra.mxu3 %v6071_v27  ;;  %v4092_v13 = vor.u32 %v4616_v2, %v4089_v3  ;;  %v4064_v25 = vor.u32 %v4609_v16, %v4061_v17  ;;  %v4665_v2 = vld [vmem:[%s6931_s7 + $0x69c] sm:$0xf]  ;;  %v4658_v17 = vld [vmem:[%s6931_s7 + $0x664] sm:$0xf]  ;;  %v3759_v60 = vld [vmem:[%s6931_s7 + $0x278] sm:$0xf] }
 0x1e5   :  { %2639 = vmatpush.bf16.msra.mxu1 %v3696_v22  ;;  %2661 = vmatpush.bf16.msra.mxu3 %v4312_v23  ;;  %v4532_v22 = vld [vmem:[%s6931_s7 + $0x274] sm:$0xf]  ;;  %v3753_v23 = vld [vmem:[%s6931_s7 + $0x28c] sm:$0xf0] }
 0x1e6   :  { %2599 = vmatmul.bf16.vlgmr.msrb.gmra.mxu2 %v5989_v38  ;;  %v3756_v32 = vor.u32 %v4532_v22, %v3753_v23  ;;  %v4574_v23 = vld [vmem:[%s6931_s7 + $0x3c4] sm:$0xf] }
 0x1e7   :  { %2676 = vmatpush.bf16.msrb.mxu0 %v3616_v19  ;;  %2651 = vmatpush.bf16.msra.mxu2 %v3976_v31  ;;  %v3784_v19 = vor.u32 %v4539_v10, %v3781_v11  ;;  %v4172_v31 = vor.u32 %v4640_v21, %v4171_v20  ;;  %v4581_v10 = vld [vmem:[%s6931_s7 + $0x3fc] sm:$0xf]  ;;  %v3949_v11 = vld [vmem:[%s6931_s7 + $0x414] sm:$0xf0]  ;;  %v3843_v20 = vld [vmem:[%s6931_s7 + $0x320] sm:$0xf] }
 0x1e8   :  { %v4557_v21 = vld [vmem:[%s6931_s7 + $0x338] sm:$0xf0] }
 0x1e9   :  { %2640 = vmatpush.bf16.msra.mxu1 %v3668_v36  ;;  %2662 = vmatpush.bf16.msra.mxu3 %v4284_v37  ;;  %v4525_v36 = vld [vmem:[%s6931_s7 + $0x23c] sm:$0xf]  ;;  %v3725_v37 = vld [vmem:[%s6931_s7 + $0x254] sm:$0xf0]  ;;  %v3844_v29 = vor.u32 %v4557_v21, %v3843_v20  ;;  %v4498_v20 = vld [vmem:[%s6931_s7 + $0x164] sm:$0xf] }
 0x1ea   :  { %v3728_v41 = vor.u32 %v4525_v36, %v3725_v37  ;;  %v3893_v36 = vld [vmem:[%s6931_s7 + $0x3a4] sm:$0xf0]  ;;  %v3507_v37 = vld [vmem:[%s6931_s7 + $0x80] sm:$0xf] }
 0x1eb   :  { %2677 = vmatpush.bf16.msrb.mxu0 %v3588_v34  ;;  %2652 = vmatpush.bf16.msra.mxu2 %v3948_v45  ;;  %v3647_v34 = vld [vmem:[%s6931_s7 + $0x198] sm:$0xf]  ;;  %v4144_v45 = vor.u32 %v4633_v5, %v4143_v33  ;;  %v3815_v33 = vld [vmem:[%s6931_s7 + $0x2e8] sm:$0xf]  ;;  %v4567_v5 = vld [vmem:[%s6931_s7 + $0x38c] sm:$0xf] }
 0x1ec   :  { %2641 = vmatmul.bf16.vlgmr.msra.gmra.mxu1 %v5945_v4  ;;  %v3621_v21 = vld [vmem:[%s6931_s7 + $0x17c] sm:$0xf0] }
 0x1ed   :  { %2689 = vmatpush.bf16.msrb.mxu1 %v3868_v42  ;;  %2663 = vmatpush.bf16.msra.mxu3 %v4256_v49  ;;  %v3648_v42 = vor.u32 %v4508_v35, %v3647_v34  ;;  %v4518_v49 = vld [vmem:[%s6931_s7 + $0x204] sm:$0xf] }
 0x1ee   :  { %v4550_v34 = vld [vmem:[%s6931_s7 + $0x300] sm:$0xf0] }
 0x1ef   :  { %2678 = vmatpush.bf16.msrb.mxu0 %v3560_v47  ;;  %2653 = vmatpush.bf16.msra.mxu2 %v3920_v55  ;;  %v3619_v47 = vld [vmem:[%s6931_s7 + $0x160] sm:$0xf]  ;;  %v4588_v55 = vld [vmem:[%s6931_s7 + $0x434] sm:$0xf]  ;;  %v3816_v44 = vor.u32 %v4550_v34, %v3815_v33 }
 0x1f0   :  { %v3620_v54 = vor.u32 %v4501_v48, %v3619_v47  ;;  %v3980_v3 = vor.u32 %v4588_v55, %v3977_v56  ;;  %v4637_v56 = vld [vmem:[%s6931_s7 + $0x5bc] sm:$0xf]  ;;  %v4592_v33 = vld [vmem:[%s6931_s7 + $0x450] sm:$0xf0] }
 0x1f1   :  { %2690 = vmatpush.bf16.msrb.mxu1 %v3840_v52  ;;  %2664 = vmatpush.bf16.msra.mxu3 %v4228_v63  ;;  %v4672_v52 = vld [vmem:[%s6931_s7 + $0x6d4] sm:$0xf]  ;;  %v4511_v63 = vld [vmem:[%s6931_s7 + $0x1cc] sm:$0xf] }
 0x1f2   :  { %v4316_v61 = vor.u32 %v4672_v52, %v4313_v53  ;;  %v4067_v52 = vld [vmem:[%s6931_s7 + $0x4e0] sm:$0xf]  ;;  %v4613_v53 = vld [vmem:[%s6931_s7 + $0x4f8] sm:$0xf0] }
 0x1f3   :  { %2679 = vmatpush.bf16.msrb.mxu0 %v3532_v58  ;;  %2654 = vmatpush.bf16.msra.mxu2 %v3892_v8  ;;  %v3700_v58 = vor.u32 %v4518_v49, %v3697_v50  ;;  %v4564_v8 = vld [vmem:[%s6931_s7 + $0x370] sm:$0xf0]  ;;  %v4543_v49 = vld [vmem:[%s6931_s7 + $0x2c8] sm:$0xf0]  ;;  %v3479_v50 = vld [vmem:[%s6931_s7 + $0x48] sm:$0xf]  ;;  %v4068_v59 = vor.u32 %v4613_v53, %v4067_v52 }
 0x1f4   :  { %2613 = vmatmul.bf16.vlgmr.msrb.gmra.mxu3 %v6071_v27  ;;  %v3872_v16 = vor.u32 %v4564_v8, %v3871_v7  ;;  %v3788_v55 = vor.u32 %v4543_v49, %v3787_v1  ;;  %v4505_v7 = vld [vmem:[%s6931_s7 + $0x19c] sm:$0xf]  ;;  %v3649_v8 = vld [vmem:[%s6931_s7 + $0x1b4] sm:$0xf0]  ;;  %v4484_v1 = vld [vmem:[%s6931_s7 + $0xf4] sm:$0xf] }
 0x1f5   :  { %2691 = vmatpush.bf16.msrb.mxu1 %v3812_v6  ;;  %2665 = vmatpush.bf16.msra.mxu3 %v4200_v18  ;;  %v4285_v6 = vld [vmem:[%s6931_s7 + $0x6b4] sm:$0xf0]  ;;  %v3952_v18 = vor.u32 %v4581_v10, %v3949_v11  ;;  %v4630_v10 = vld [vmem:[%s6931_s7 + $0x584] sm:$0xf]  ;;  %v4145_v11 = vld [vmem:[%s6931_s7 + $0x59c] sm:$0xf0] }
 0x1f6   :  { %2655 = vmatmul.bf16.vlgmr.msra.gmra.mxu2 %v5989_v38  ;;  %v4288_v15 = vor.u32 %v4665_v2, %v4285_v6  ;;  %v4039_v2 = vld [vmem:[%s6931_s7 + $0x4a8] sm:$0xf]  ;;  %v3565_v49 = vld [vmem:[%s6931_s7 + $0x10c] sm:$0xf0] }
 0x1f7   :  { %2680 = vmatpush.bf16.msrb.mxu0 %v3504_v12  ;;  %2703 = vmatpush.bf16.msrb.mxu2 %v4092_v13  ;;  %v3672_v12 = vor.u32 %v4511_v63, %v3669_v0  ;;  %v3563_v13 = vld [vmem:[%s6931_s7 + $0xf0] sm:$0xf]  ;;  %v4459_v0 = vld [vmem:[%s6931_s7 + $0x28] sm:$0xf0] }
 0x1f8   :  { %v3564_v22 = vor.u32 %v4487_v14, %v3563_v13  ;;  %v3451_v63 = vld [vmem:[%s6931_s7 + $0x10] sm:$0xf]  ;;  %v3731_v14 = vld [vmem:[%s6931_s7 + $0x240] sm:$0xf] }
 0x1f9   :  { %2692 = vmatpush.bf16.msrb.mxu1 %v3784_v19  ;;  %2666 = vmatpush.bf16.msra.mxu3 %v4172_v31  ;;  %v4257_v19 = vld [vmem:[%s6931_s7 + $0x67c] sm:$0xf0] }
 0x1fa   :  { %v4260_v28 = vor.u32 %v4658_v17, %v4257_v19  ;;  %v4011_v17 = vld [vmem:[%s6931_s7 + $0x470] sm:$0xf]  ;;  %v4148_v19 = vor.u32 %v4630_v10, %v4145_v11 }
 0x1fb   :  { %2681 = vmatpush.bf16.msrb.mxu0 %v3476_v24  ;;  %2704 = vmatpush.bf16.msrb.mxu2 %v4064_v25  ;;  %v3921_v24 = vld [vmem:[%s6931_s7 + $0x3dc] sm:$0xf0]  ;;  %v3535_v25 = vld [vmem:[%s6931_s7 + $0xb8] sm:$0xf]  ;;  %v3899_v11 = vld [vmem:[%s6931_s7 + $0x390] sm:$0xf] }
 0x1fc   :  { %v3924_v31 = vor.u32 %v4574_v23, %v3921_v24  ;;  %v3536_v35 = vor.u32 %v4480_v26, %v3535_v25  ;;  %v4623_v23 = vld [vmem:[%s6931_s7 + $0x54c] sm:$0xf]  ;;  %v4117_v24 = vld [vmem:[%s6931_s7 + $0x564] sm:$0xf0] }
 0x1fd   :  { %2693 = vmatpush.bf16.msrb.mxu1 %v3756_v32  ;;  %2667 = vmatpush.bf16.msra.mxu3 %v4144_v45  ;;  %v4229_v32 = vld [vmem:[%s6931_s7 + $0x644] sm:$0xf0]  ;;  %v3896_v45 = vor.u32 %v4567_v5, %v3893_v36  ;;  %v4120_v34 = vor.u32 %v4623_v23, %v4117_v24  ;;  %v4540_v24 = vld [vmem:[%s6931_s7 + $0x2b4] sm:$0xf] }
 0x1fe   :  { %v4232_v43 = vor.u32 %v4651_v30, %v4229_v32  ;;  %v3703_v25 = vld [vmem:[%s6931_s7 + $0x208] sm:$0xf]  ;;  %v4676_v30 = vld [vmem:[%s6931_s7 + $0x6f0] sm:$0xf0]  ;;  %v3983_v32 = vld [vmem:[%s6931_s7 + $0x438] sm:$0xf] }
 0x1ff   :  { %2682 = vmatpush.bf16.msrb.mxu0 %v3448_v39  ;;  %2705 = vmatpush.bf16.msrb.mxu2 %v4036_v62  ;;  %v4473_v39 = vld [vmem:[%s6931_s7 + $0x98] sm:$0xf0]  ;;  %v4095_v62 = vld [vmem:[%s6931_s7 + $0x518] sm:$0xf]  ;;  %v3593_v5 = vld [vmem:[%s6931_s7 + $0x144] sm:$0xf0] }
 0x200   :  { %v3508_v47 = vor.u32 %v4473_v39, %v3507_v37  ;;  %v3675_v39 = vld [vmem:[%s6931_s7 + $0x1d0] sm:$0xf] }
 0x201   :  { %2694 = vmatpush.bf16.msrb.mxu1 %v3728_v41  ;;  %2668 = vmatpush.bf16.msra.mxu3 %v4116_v57  ;;  %v4644_v41 = vld [vmem:[%s6931_s7 + $0x5f4] sm:$0xf]  ;;  %v4173_v57 = vld [vmem:[%s6931_s7 + $0x5d4] sm:$0xf0] }
 0x202   :  { %2683 = vmatmul.bf16.vlgmr.msrb.gmra.mxu0 %v5911_v40  ;;  %v4176_v6 = vor.u32 %v4637_v56, %v4173_v57  ;;  %v4554_v56 = vld [vmem:[%s6931_s7 + $0x324] sm:$0xf]  ;;  %v3568_v57 = vor.u32 %v4484_v1, %v3565_v49 }
 0x203   :  { %2731 = vmatpush.bf16.msra.mxu0 %v3648_v42  ;;  %2706 = vmatpush.bf16.msrb.mxu2 %v4008_v51  ;;  %v4620_v42 = vld [vmem:[%s6931_s7 + $0x530] sm:$0xf0]  ;;  %v4466_v51 = vld [vmem:[%s6931_s7 + $0x60] sm:$0xf0] }
 0x204   :  { %2669 = vmatmul.bf16.vlgmr.msra.gmra.mxu3 %v6071_v27  ;;  %v4096_v48 = vor.u32 %v4620_v42, %v4095_v62  ;;  %v4515_v62 = vld [vmem:[%s6931_s7 + $0x1e8] sm:$0xf0]  ;;  %v3984_v42 = vor.u32 %v4592_v33, %v3983_v32  ;;  %v4179_v33 = vld [vmem:[%s6931_s7 + $0x5c0] sm:$0xf] }
 0x205   :  { %2695 = vmatpush.bf16.msrb.mxu1 %v3700_v58  ;;  %2717 = vmatpush.bf16.msrb.mxu3 %v4316_v61  ;;  %v3480_v58 = vor.u32 %v4466_v51, %v3479_v50  ;;  %v4536_v61 = vld [vmem:[%s6931_s7 + $0x290] sm:$0xf0]  ;;  %v3676_v50 = vor.u32 %v4515_v62, %v3675_v39  ;;  %v3453_v62 = vld [vmem:[%s6931_s7 + $0x2c] sm:$0xf0] }
 0x206   :  { %v4456_v39 = vld [vmem:[%s6931_s7 + $0x14] sm:$0xf] }
 0x207   :  { %2732 = vmatpush.bf16.msra.mxu0 %v3620_v54  ;;  %2707 = vmatpush.bf16.msrb.mxu2 %v3980_v3  ;;  %v4204_v54 = vor.u32 %v4644_v41, %v4201_v46  ;;  %v4606_v3 = vld [vmem:[%s6931_s7 + $0x4c0] sm:$0xf0]  ;;  %v3873_v46 = vld [vmem:[%s6931_s7 + $0x374] sm:$0xf0]  ;;  %v3456_v1 = vor.u32 %v4456_v39, %v3453_v62  ;;  %v4481_v39 = vld [vmem:[%s6931_s7 + $0xd8] sm:$0xf0] }
 0x208   :  { %v4040_v13 = vor.u32 %v4606_v3, %v4039_v2  ;;  %v4235_v2 = vld [vmem:[%s6931_s7 + $0x630] sm:$0xf] }
 0x209   :  { %2696 = vmatpush.bf16.msrb.mxu1 %v3672_v12  ;;  %2718 = vmatpush.bf16.msrb.mxu3 %v4288_v15  ;;  %v3452_v12 = vor.u32 %v4459_v0, %v3451_v63  ;;  %v4529_v15 = vld [vmem:[%s6931_s7 + $0x258] sm:$0xf0]  ;;  %v3537_v63 = vld [vmem:[%s6931_s7 + $0xd4] sm:$0xf0] }
 0x20b   :  { %2733 = vmatpush.bf16.msra.mxu0 %v3592_v9  ;;  %2708 = vmatpush.bf16.msrb.mxu2 %v3952_v18  ;;  %v3760_v9 = vor.u32 %v4536_v61, %v3759_v60  ;;  %v4599_v18 = vld [vmem:[%s6931_s7 + $0x488] sm:$0xf0]  ;;  %v4578_v60 = vld [vmem:[%s6931_s7 + $0x3e0] sm:$0xf0]  ;;  %v4477_v61 = vld [vmem:[%s6931_s7 + $0xbc] sm:$0xf] }
 0x20c   :  { %2697 = vmatmul.bf16.vlgmr.msrb.gmra.mxu1 %v5945_v4  ;;  %v4012_v26 = vor.u32 %v4599_v18, %v4011_v17  ;;  %v3540_v10 = vor.u32 %v4477_v61, %v3537_v63  ;;  %v4519_v61 = vld [vmem:[%s6931_s7 + $0x20c] sm:$0xf] }
 0x20d   :  { %2745 = vmatpush.bf16.msra.mxu1 %v3872_v16  ;;  %2719 = vmatpush.bf16.msrb.mxu3 %v4260_v28  ;;  %v3652_v16 = vor.u32 %v4505_v7, %v3649_v8  ;;  %v4522_v28 = vld [vmem:[%s6931_s7 + $0x220] sm:$0xf0]  ;;  %v4655_v7 = vld [vmem:[%s6931_s7 + $0x648] sm:$0xf0] }
 0x20e   :  { %v3704_v36 = vor.u32 %v4522_v28, %v3703_v25  ;;  %v4547_v8 = vld [vmem:[%s6931_s7 + $0x2ec] sm:$0xf]  ;;  %v4236_v17 = vor.u32 %v4655_v7, %v4235_v2  ;;  %v3789_v25 = vld [vmem:[%s6931_s7 + $0x2cc] sm:$0xf0]  ;;  %v3481_v28 = vld [vmem:[%s6931_s7 + $0x64] sm:$0xf0] }
 0x20f   :  { %2734 = vmatpush.bf16.msra.mxu0 %v3564_v22  ;;  %2709 = vmatpush.bf16.msrb.mxu2 %v3924_v31  ;;  %v3732_v22 = vor.u32 %v4529_v15, %v3731_v14  ;;  %v3624_v31 = vor.u32 %v4498_v20, %v3621_v21  ;;  %v3509_v14 = vld [vmem:[%s6931_s7 + $0x9c] sm:$0xf0]  ;;  %v4617_v15 = vld [vmem:[%s6931_s7 + $0x51c] sm:$0xf]  ;;  %v4207_v20 = vld [vmem:[%s6931_s7 + $0x5f8] sm:$0xf]  ;;  %v3792_v32 = vor.u32 %v4540_v24, %v3789_v25 }
 0x210   :  { %v4648_v21 = vld [vmem:[%s6931_s7 + $0x610] sm:$0xf0]  ;;  %v4673_v2 = vld [vmem:[%s6931_s7 + $0x6dc] sm:$0xf]  ;;  %v3571_v24 = vld [vmem:[%s6931_s7 + $0xf8] sm:$0xf] }
 0x211   :  { %2746 = vmatpush.bf16.msra.mxu1 %v3844_v29  ;;  %2720 = vmatpush.bf16.msrb.mxu3 %v4232_v43  ;;  %v4319_v29 = vld [vmem:[%s6931_s7 + $0x6d8] sm:$0xf]  ;;  %v4291_v43 = vld [vmem:[%s6931_s7 + $0x6a0] sm:$0xf]  ;;  %v4589_v7 = vld [vmem:[%s6931_s7 + $0x43c] sm:$0xf] }
 0x212   :  { %v4320_v37 = vor.u32 %v4676_v30, %v4319_v29  ;;  %v4610_v29 = vld [vmem:[%s6931_s7 + $0x4e4] sm:$0xf]  ;;  %v4069_v30 = vld [vmem:[%s6931_s7 + $0x4fc] sm:$0xf0]  ;;  %v4488_v25 = vld [vmem:[%s6931_s7 + $0x110] sm:$0xf0] }
 0x213   :  { %2735 = vmatpush.bf16.msra.mxu0 %v3536_v35  ;;  %2710 = vmatpush.bf16.msrb.mxu2 %v3896_v45  ;;  %v4491_v35 = vld [vmem:[%s6931_s7 + $0x12c] sm:$0xf]  ;;  %v4561_v45 = vld [vmem:[%s6931_s7 + $0x35c] sm:$0xf] }
 0x214   :  { %v3596_v41 = vor.u32 %v4491_v35, %v3593_v5  ;;  %v3876_v52 = vor.u32 %v4561_v45, %v3873_v46  ;;  %v4072_v5 = vor.u32 %v4610_v29, %v4069_v30  ;;  %v3655_v45 = vld [vmem:[%s6931_s7 + $0x1a0] sm:$0xf] }
 0x215   :  { %2747 = vmatpush.bf16.msra.mxu1 %v3816_v44  ;;  %2721 = vmatpush.bf16.msrb.mxu3 %v4204_v54  ;;  %v4669_v44 = vld [vmem:[%s6931_s7 + $0x6b8] sm:$0xf0]  ;;  %v4263_v54 = vld [vmem:[%s6931_s7 + $0x668] sm:$0xf] }
 0x216   :  { %2711 = vmatmul.bf16.vlgmr.msrb.gmra.mxu2 %v5989_v38  ;;  %v4292_v51 = vor.u32 %v4669_v44, %v4291_v43  ;;  %v4041_v43 = vld [vmem:[%s6931_s7 + $0x4c4] sm:$0xf0] }
 0x217   :  { %2736 = vmatpush.bf16.msra.mxu0 %v3508_v47  ;;  %2759 = vmatpush.bf16.msra.mxu2 %v4096_v48  ;;  %v3955_v47 = vld [vmem:[%s6931_s7 + $0x400] sm:$0xf]  ;;  %v4585_v48 = vld [vmem:[%s6931_s7 + $0x418] sm:$0xf0] }
 0x218   :  { %v3956_v53 = vor.u32 %v4585_v48, %v3955_v47  ;;  %v4151_v47 = vld [vmem:[%s6931_s7 + $0x588] sm:$0xf]  ;;  %v4634_v48 = vld [vmem:[%s6931_s7 + $0x5a0] sm:$0xf0] }
 0x219   :  { %2748 = vmatpush.bf16.msra.mxu1 %v3788_v55  ;;  %2722 = vmatpush.bf16.msrb.mxu3 %v4176_v6  ;;  %v4662_v55 = vld [vmem:[%s6931_s7 + $0x680] sm:$0xf0] }
 0x21a   :  { %v4264_v0 = vor.u32 %v4662_v55, %v4263_v54  ;;  %v4013_v54 = vld [vmem:[%s6931_s7 + $0x48c] sm:$0xf0]  ;;  %v4152_v55 = vor.u32 %v4634_v48, %v4151_v47  ;;  %v4568_v48 = vld [vmem:[%s6931_s7 + $0x394] sm:$0xf] }
 0x21b   :  { %2737 = vmatpush.bf16.msra.mxu0 %v3480_v58  ;;  %2760 = vmatpush.bf16.msra.mxu2 %v4068_v59  ;;  %v3845_v58 = vld [vmem:[%s6931_s7 + $0x33c] sm:$0xf0]  ;;  %v3927_v59 = vld [vmem:[%s6931_s7 + $0x3c8] sm:$0xf] }
 0x21c   :  { %v3848_v3 = vor.u32 %v4554_v56, %v3845_v58  ;;  %v3928_v6 = vor.u32 %v4578_v60, %v3927_v59  ;;  %v3627_v56 = vld [vmem:[%s6931_s7 + $0x168] sm:$0xf]  ;;  %v4123_v59 = vld [vmem:[%s6931_s7 + $0x550] sm:$0xf]  ;;  %v4627_v60 = vld [vmem:[%s6931_s7 + $0x568] sm:$0xf0] }
 0x21d   :  { %2749 = vmatpush.bf16.msra.mxu1 %v3760_v9  ;;  %2723 = vmatpush.bf16.msrb.mxu3 %v4148_v19  ;;  %v3817_v9 = vld [vmem:[%s6931_s7 + $0x304] sm:$0xf0] }
 0x21e   :  { %v3820_v18 = vor.u32 %v4547_v8, %v3817_v9  ;;  %v3985_v8 = vld [vmem:[%s6931_s7 + $0x454] sm:$0xf0]  ;;  %v4124_v9 = vor.u32 %v4627_v60, %v4123_v59 }
 0x21f   :  { %2738 = vmatpush.bf16.msra.mxu0 %v3452_v12  ;;  %2761 = vmatpush.bf16.msra.mxu2 %v4040_v13  ;;  %v4571_v12 = vld [vmem:[%s6931_s7 + $0x3a8] sm:$0xf0]  ;;  %v4470_v13 = vld [vmem:[%s6931_s7 + $0x84] sm:$0xf]  ;;  %v3795_v60 = vld [vmem:[%s6931_s7 + $0x2b8] sm:$0xf] }
 0x220   :  { %v3900_v19 = vor.u32 %v4571_v12, %v3899_v11  ;;  %v4495_v11 = vld [vmem:[%s6931_s7 + $0x148] sm:$0xf0] }
 0x221   :  { %2750 = vmatpush.bf16.msra.mxu1 %v3732_v22  ;;  %2724 = vmatpush.bf16.msrb.mxu3 %v4120_v34  ;;  %v3512_v22 = vor.u32 %v4470_v13, %v3509_v14  ;;  %v4641_v34 = vld [vmem:[%s6931_s7 + $0x5d8] sm:$0xf0]  ;;  %v4512_v14 = vld [vmem:[%s6931_s7 + $0x1d4] sm:$0xf] }
 0x222   :  { %2739 = vmatmul.bf16.vlgmr.msra.gmra.mxu0 %v5911_v40  ;;  %v4180_v44 = vor.u32 %v4641_v34, %v4179_v33  ;;  %v3851_v33 = vld [vmem:[%s6931_s7 + $0x328] sm:$0xf]  ;;  %v3572_v34 = vor.u32 %v4488_v25, %v3571_v24  ;;  %v4530_v25 = vld [vmem:[%s6931_s7 + $0x260] sm:$0xf0] }
 0x223   :  { %2787 = vmatpush.bf16.msrb.mxu0 %v3652_v16  ;;  %2762 = vmatpush.bf16.msra.mxu2 %v4012_v26  ;;  %v4097_v16 = vld [vmem:[%s6931_s7 + $0x534] sm:$0xf0]  ;;  %v4463_v26 = vld [vmem:[%s6931_s7 + $0x4c] sm:$0xf]  ;;  %v3739_v24 = vld [vmem:[%s6931_s7 + $0x248] sm:$0xf] }
 0x224   :  { %2725 = vmatmul.bf16.vlgmr.msrb.gmra.mxu3 %v6071_v27  ;;  %v4100_v23 = vor.u32 %v4617_v15, %v4097_v16  ;;  %v3484_v35 = vor.u32 %v4463_v26, %v3481_v28  ;;  %v3677_v15 = vld [vmem:[%s6931_s7 + $0x1ec] sm:$0xf0]  ;;  %v3988_v16 = vor.u32 %v4589_v7, %v3985_v8  ;;  %v4638_v8 = vld [vmem:[%s6931_s7 + $0x5c4] sm:$0xf] }
 0x225   :  { %2751 = vmatpush.bf16.msra.mxu1 %v3704_v36  ;;  %2773 = vmatpush.bf16.msra.mxu3 %v4320_v37  ;;  %v4533_v36 = vld [vmem:[%s6931_s7 + $0x27c] sm:$0xf]  ;;  %v3761_v37 = vld [vmem:[%s6931_s7 + $0x294] sm:$0xf0]  ;;  %v3680_v26 = vor.u32 %v4512_v14, %v3677_v15  ;;  %v4460_v15 = vld [vmem:[%s6931_s7 + $0x30] sm:$0xf0] }
 0x226   :  { %v3764_v46 = vor.u32 %v4533_v36, %v3761_v37  ;;  %v3929_v36 = vld [vmem:[%s6931_s7 + $0x3e4] sm:$0xf0]  ;;  %v3543_v37 = vld [vmem:[%s6931_s7 + $0xc0] sm:$0xf]  ;;  %v3459_v14 = vld [vmem:[%s6931_s7 + $0x18] sm:$0xf] }
 0x227   :  { %2788 = vmatpush.bf16.msrb.mxu0 %v3624_v31  ;;  %2763 = vmatpush.bf16.msra.mxu2 %v3984_v42  ;;  %v4208_v31 = vor.u32 %v4648_v21, %v4207_v20  ;;  %v4603_v42 = vld [vmem:[%s6931_s7 + $0x4ac] sm:$0xf]  ;;  %v4565_v21 = vld [vmem:[%s6931_s7 + $0x378] sm:$0xf0]  ;;  %v3544_v47 = vor.u32 %v4481_v39, %v3543_v37  ;;  %v3991_v37 = vld [vmem:[%s6931_s7 + $0x440] sm:$0xf] }
 0x228   :  { %v4044_v49 = vor.u32 %v4603_v42, %v4041_v43  ;;  %v4652_v42 = vld [vmem:[%s6931_s7 + $0x634] sm:$0xf]  ;;  %v4593_v39 = vld [vmem:[%s6931_s7 + $0x458] sm:$0xf0] }
 0x229   :  { %2752 = vmatpush.bf16.msra.mxu1 %v3676_v50  ;;  %2774 = vmatpush.bf16.msra.mxu3 %v4292_v51  ;;  %v4526_v50 = vld [vmem:[%s6931_s7 + $0x244] sm:$0xf]  ;;  %v3733_v51 = vld [vmem:[%s6931_s7 + $0x25c] sm:$0xf0] }
 0x22a   :  { %v3736_v58 = vor.u32 %v4526_v50, %v3733_v51  ;;  %v4474_v50 = vld [vmem:[%s6931_s7 + $0xa0] sm:$0xf0]  ;;  %v4103_v51 = vld [vmem:[%s6931_s7 + $0x520] sm:$0xf] }
 0x22b   :  { %2789 = vmatpush.bf16.msrb.mxu0 %v3596_v41  ;;  %2764 = vmatpush.bf16.msra.mxu2 %v3956_v53  ;;  %v4509_v41 = vld [vmem:[%s6931_s7 + $0x1b8] sm:$0xf0]  ;;  %v4596_v53 = vld [vmem:[%s6931_s7 + $0x474] sm:$0xf] }
 0x22c   :  { %2753 = vmatmul.bf16.vlgmr.msra.gmra.mxu1 %v5945_v4  ;;  %v4016_v63 = vor.u32 %v4596_v53, %v4013_v54 }
 0x22d   :  { %2801 = vmatpush.bf16.msrb.mxu1 %v3876_v52  ;;  %2775 = vmatpush.bf16.msra.mxu3 %v4264_v0  ;;  %v3656_v52 = vor.u32 %v4509_v41, %v3655_v45  ;;  %v3705_v0 = vld [vmem:[%s6931_s7 + $0x224] sm:$0xf0]  ;;  %v4237_v45 = vld [vmem:[%s6931_s7 + $0x64c] sm:$0xf0] }
 0x22e   :  { %v3708_v12 = vor.u32 %v4519_v61, %v3705_v0  ;;  %v3823_v41 = vld [vmem:[%s6931_s7 + $0x2f0] sm:$0xf]  ;;  %v4240_v53 = vor.u32 %v4652_v42, %v4237_v45  ;;  %v4544_v61 = vld [vmem:[%s6931_s7 + $0x2d0] sm:$0xf0]  ;;  %v4467_v0 = vld [vmem:[%s6931_s7 + $0x68] sm:$0xf0] }
 0x22f   :  { %2790 = vmatpush.bf16.msrb.mxu0 %v3568_v57  ;;  %2765 = vmatpush.bf16.msra.mxu2 %v3928_v6  ;;  %v4502_v57 = vld [vmem:[%s6931_s7 + $0x180] sm:$0xf0]  ;;  %v3796_v7 = vor.u32 %v4544_v61, %v3795_v60  ;;  %v3683_v45 = vld [vmem:[%s6931_s7 + $0x1d8] sm:$0xf] }
 0x230   :  { %v3628_v6 = vor.u32 %v4502_v57, %v3627_v56  ;;  %v4645_v56 = vld [vmem:[%s6931_s7 + $0x5fc] sm:$0xf]  ;;  %v4209_v57 = vld [vmem:[%s6931_s7 + $0x614] sm:$0xf0] }
 0x231   :  { %2802 = vmatpush.bf16.msrb.mxu1 %v3848_v3  ;;  %2776 = vmatpush.bf16.msra.mxu3 %v4236_v17  ;;  %v4321_v3 = vld [vmem:[%s6931_s7 + $0x6f4] sm:$0xf0]  ;;  %v4666_v17 = vld [vmem:[%s6931_s7 + $0x6a4] sm:$0xf] }
 0x232   :  { %v4324_v13 = vor.u32 %v4673_v2, %v4321_v3  ;;  %v4075_v2 = vld [vmem:[%s6931_s7 + $0x4e8] sm:$0xf]  ;;  %v4614_v3 = vld [vmem:[%s6931_s7 + $0x500] sm:$0xf0] }
 0x233   :  { %2791 = vmatpush.bf16.msrb.mxu0 %v3540_v10  ;;  %2766 = vmatpush.bf16.msra.mxu2 %v3900_v19  ;;  %v3599_v10 = vld [vmem:[%s6931_s7 + $0x130] sm:$0xf]  ;;  %v3879_v19 = vld [vmem:[%s6931_s7 + $0x360] sm:$0xf] }
 0x234   :  { %v3600_v20 = vor.u32 %v4495_v11, %v3599_v10  ;;  %v3880_v29 = vor.u32 %v4565_v21, %v3879_v19  ;;  %v4076_v11 = vor.u32 %v4614_v3, %v4075_v2  ;;  %v4153_v21 = vld [vmem:[%s6931_s7 + $0x5a4] sm:$0xf0]  ;;  %v3907_v3 = vld [vmem:[%s6931_s7 + $0x398] sm:$0xf] }
 0x235   :  { %2803 = vmatpush.bf16.msrb.mxu1 %v3820_v18  ;;  %2777 = vmatpush.bf16.msra.mxu3 %v4208_v31  ;;  %v4293_v18 = vld [vmem:[%s6931_s7 + $0x6bc] sm:$0xf0]  ;;  %v4659_v31 = vld [vmem:[%s6931_s7 + $0x66c] sm:$0xf] }
 0x236   :  { %2767 = vmatmul.bf16.vlgmr.msra.gmra.mxu2 %v5989_v38  ;;  %v4296_v28 = vor.u32 %v4666_v17, %v4293_v18  ;;  %v4607_v17 = vld [vmem:[%s6931_s7 + $0x4c8] sm:$0xf0] }
 0x237   :  { %2792 = vmatpush.bf16.msrb.mxu0 %v3512_v22  ;;  %2815 = vmatpush.bf16.msrb.mxu2 %v4100_v23  ;;  %v4582_v22 = vld [vmem:[%s6931_s7 + $0x404] sm:$0xf]  ;;  %v3957_v23 = vld [vmem:[%s6931_s7 + $0x41c] sm:$0xf0] }
 0x238   :  { %v3960_v30 = vor.u32 %v4582_v22, %v3957_v23  ;;  %v3460_v22 = vor.u32 %v4460_v15, %v3459_v14 }
 0x239   :  { %2804 = vmatpush.bf16.msrb.mxu1 %v3792_v32  ;;  %2778 = vmatpush.bf16.msra.mxu3 %v4180_v44  ;;  %v4265_v32 = vld [vmem:[%s6931_s7 + $0x684] sm:$0xf0] }
 0x23a   :  { %v4268_v62 = vor.u32 %v4659_v31, %v4265_v32  ;;  %v4624_v31 = vld [vmem:[%s6931_s7 + $0x554] sm:$0xf]  ;;  %v4125_v32 = vld [vmem:[%s6931_s7 + $0x56c] sm:$0xf0] }
 0x23b   :  { %2793 = vmatpush.bf16.msrb.mxu0 %v3484_v35  ;;  %2816 = vmatpush.bf16.msrb.mxu2 %v4072_v5  ;;  %v4558_v35 = vld [vmem:[%s6931_s7 + $0x340] sm:$0xf0]  ;;  %v4575_v5 = vld [vmem:[%s6931_s7 + $0x3cc] sm:$0xf] }
 0x23c   :  { %v3852_v43 = vor.u32 %v4558_v35, %v3851_v33  ;;  %v3932_v44 = vor.u32 %v4575_v5, %v3929_v36  ;;  %v3711_v33 = vld [vmem:[%s6931_s7 + $0x210] sm:$0xf]  ;;  %v4523_v35 = vld [vmem:[%s6931_s7 + $0x228] sm:$0xf0]  ;;  %v4327_v5 = vld [vmem:[%s6931_s7 + $0x6e0] sm:$0xf] }
 0x23d   :  { %2805 = vmatpush.bf16.msrb.mxu1 %v3764_v46  ;;  %2779 = vmatpush.bf16.msra.mxu3 %v4152_v55  ;;  %v4551_v46 = vld [vmem:[%s6931_s7 + $0x308] sm:$0xf0]  ;;  %v4677_v36 = vld [vmem:[%s6931_s7 + $0x6f8] sm:$0xf0] }
 0x23e   :  { %v3824_v54 = vor.u32 %v4551_v46, %v3823_v41  ;;  %v3992_v41 = vor.u32 %v4593_v39, %v3991_v37  ;;  %v4516_v46 = vld [vmem:[%s6931_s7 + $0x1f0] sm:$0xf0] }
 0x23f   :  { %2794 = vmatpush.bf16.msrb.mxu0 %v3456_v1  ;;  %2817 = vmatpush.bf16.msrb.mxu2 %v4044_v49  ;;  %v3901_v1 = vld [vmem:[%s6931_s7 + $0x3ac] sm:$0xf0]  ;;  %v3515_v49 = vld [vmem:[%s6931_s7 + $0x88] sm:$0xf]  ;;  %v2516_v42 = vpop.f32.mrf.mxu0 }
 0x240   :  { %v3904_v55 = vor.u32 %v4568_v48, %v3901_v1  ;;  %v3963_v1 = vld [vmem:[%s6931_s7 + $0x408] sm:$0xf] }
 0x241   :  { %2806 = vmatpush.bf16.msrb.mxu1 %v3736_v58  ;;  %2780 = vmatpush.bf16.msra.mxu3 %v4124_v9  ;;  %v3516_v58 = vor.u32 %v4474_v50, %v3515_v49  ;;  %v4181_v9 = vld [vmem:[%s6931_s7 + $0x5dc] sm:$0xf0]  ;;  %v4586_v49 = vld [vmem:[%s6931_s7 + $0x420] sm:$0xf0] }
 0x242   :  { %2795 = vmatmul.bf16.vlgmr.msrb.gmra.mxu0 %v5911_v40  ;;  %v4184_v18 = vor.u32 %v4638_v8, %v4181_v9 }
 0x243   :  { %2843 = vmatpush.bf16.msra.mxu0 %v3656_v52  ;;  %2818 = vmatpush.bf16.msrb.mxu2 %v4016_v63  ;;  %v4621_v52 = vld [vmem:[%s6931_s7 + $0x538] sm:$0xf0]  ;;  %v3487_v63 = vld [vmem:[%s6931_s7 + $0x50] sm:$0xf] }
 0x244   :  { %2781 = vmatmul.bf16.vlgmr.msra.gmra.mxu3 %v6071_v27  ;;  %v4104_v59 = vor.u32 %v4621_v52, %v4103_v51  ;;  %v3488_v10 = vor.u32 %v4467_v0, %v3487_v63  ;;  %v3684_v51 = vor.u32 %v4516_v46, %v3683_v45  ;;  %v4243_v63 = vld [vmem:[%s6931_s7 + $0x638] sm:$0xf]  ;;  %v4656_v0 = vld [vmem:[%s6931_s7 + $0x650] sm:$0xf0] }
 0x245   :  { %2807 = vmatpush.bf16.msrb.mxu1 %v3708_v12  ;;  %2829 = vmatpush.bf16.msrb.mxu3 %v4324_v13  ;;  %v3767_v12 = vld [vmem:[%s6931_s7 + $0x280] sm:$0xf]  ;;  %v4537_v13 = vld [vmem:[%s6931_s7 + $0x298] sm:$0xf0]  ;;  %v4244_v9 = vor.u32 %v4656_v0, %v4243_v63 }
 0x246   :  { %v3768_v19 = vor.u32 %v4537_v13, %v3767_v12  ;;  %v4649_v12 = vld [vmem:[%s6931_s7 + $0x618] sm:$0xf0] }
 0x247   :  { %2844 = vmatpush.bf16.msra.mxu0 %v3628_v6  ;;  %2819 = vmatpush.bf16.msrb.mxu2 %v3988_v16  ;;  %v4212_v6 = vor.u32 %v4645_v56, %v4209_v57  ;;  %v4047_v16 = vld [vmem:[%s6931_s7 + $0x4b0] sm:$0xf]  ;;  %v4663_v56 = vld [vmem:[%s6931_s7 + $0x688] sm:$0xf0]  ;;  %v2518_v2 = vpop.f32.mrf.mxu0 }
 0x248   :  { %v4048_v23 = vor.u32 %v4607_v17, %v4047_v16  ;;  %v2530_v48 = vpop.f32.mrf.mxu1  ;;  %v3935_v57 = vld [vmem:[%s6931_s7 + $0x3d0] sm:$0xf]  ;;  %v4187_v17 = vld [vmem:[%s6931_s7 + $0x5c8] sm:$0xf] }
 0x249   :  { %2808 = vmatpush.bf16.msrb.mxu1 %v3680_v26  ;;  %2830 = vmatpush.bf16.msrb.mxu3 %v4296_v28  ;;  %v4019_v26 = vld [vmem:[%s6931_s7 + $0x478] sm:$0xf]  ;;  %v4600_v28 = vld [vmem:[%s6931_s7 + $0x490] sm:$0xf0] }
 0x24b   :  { %2845 = vmatpush.bf16.msra.mxu0 %v3600_v20  ;;  %2820 = vmatpush.bf16.msrb.mxu2 %v3960_v30  ;;  %v4631_v20 = vld [vmem:[%s6931_s7 + $0x58c] sm:$0xf]  ;;  %v3740_v30 = vor.u32 %v4530_v25, %v3739_v24 }
 0x24c   :  { %2809 = vmatmul.bf16.vlgmr.msrb.gmra.mxu1 %v5945_v4  ;;  %v4635_v24 = vld [vmem:[%s6931_s7 + $0x5a8] sm:$0xf0] }
 0x24d   :  { %2857 = vmatpush.bf16.msra.mxu1 %v3880_v29  ;;  %2831 = vmatpush.bf16.msrb.mxu3 %v4268_v62  ;;  %v4156_v29 = vor.u32 %v4631_v20, %v4153_v21  ;;  %v4128_v62 = vor.u32 %v4624_v31, %v4125_v32 }
 0x24f   :  { %2846 = vmatpush.bf16.msra.mxu0 %v3572_v34  ;;  %2821 = vmatpush.bf16.msrb.mxu2 %v3932_v44  ;;  %v4020_v34 = vor.u32 %v4600_v28, %v4019_v26  ;;  %v4328_v44 = vor.u32 %v4677_v36, %v4327_v5  ;;  %v2572_v21 = vpop.f32.mrf.mxu0 }
 0x250   :  { %v2532_v8 = vpop.f32.mrf.mxu1 }
 0x251   :  { %2858 = vmatpush.bf16.msra.mxu1 %v3852_v43  ;;  %2832 = vmatpush.bf16.msrb.mxu3 %v4240_v53  ;;  %v3712_v43 = vor.u32 %v4523_v35, %v3711_v33  ;;  %v6860_v53 = vld [vmem:[%s6932_s8] sm:$0x7f]  ;;  %v4628_v33 = vld [vmem:[%s6931_s7 + $0x570] sm:$0xf0]  ;;  %s4710_s8 = smov 56  }
 0x252   :  { %v1342_v31 = vperm.slane %v6860_v53, 1 }
 0x253   :  { %2847 = vmatpush.bf16.msra.mxu0 %v3544_v47  ;;  %2822 = vmatpush.bf16.msrb.mxu2 %v3904_v55  ;;  %v4299_v47 = vld [vmem:[%s6931_s7 + $0x6a8] sm:$0xf]  ;;  %v4271_v55 = vld [vmem:[%s6931_s7 + $0x670] sm:$0xf] }
 0x254   :  { %v4272_v60 = vor.u32 %v4663_v56, %v4271_v55  ;;  %v2573_v5 = vadd.f32 %v2572_v21, %v1342_v31  ;;  %v1345_v21 = vperm.slane %v6860_v53, 4 }
 0x255   :  { %2859 = vmatpush.bf16.msra.mxu1 %v3824_v54  ;;  %2833 = vmatpush.bf16.msrb.mxu3 %v4212_v6  ;;  %v3964_v54 = vor.u32 %v4586_v49, %v3963_v1  ;;  %v4572_v6 = vld [vmem:[%s6931_s7 + $0x3b0] sm:$0xf0] }
 0x256   :  { %2823 = vmatmul.bf16.vlgmr.msrb.gmra.mxu2 %v5989_v38 }
 0x257   :  { %2848 = vmatpush.bf16.msra.mxu0 %v3516_v58  ;;  %2871 = vmatpush.bf16.msra.mxu2 %v4104_v59  ;;  %v4579_v58 = vld [vmem:[%s6931_s7 + $0x3e8] sm:$0xf0]  ;;  %v1341_v59 = vperm.slane %v6860_v53, 0  ;;  %v2574_v36 = vpop.f32.mrf.mxu0 }
 0x258   :  { %v3936_v61 = vor.u32 %v4579_v58, %v3935_v57  ;;  %v2575_v45 = vadd.f32 %v2574_v36, %v1342_v31 }
 0x259   :  { %2860 = vmatpush.bf16.msra.mxu1 %v3796_v7  ;;  %2834 = vmatpush.bf16.msrb.mxu3 %v4184_v18  ;;  %v2544_v50 = vpop.f32.mrf.mxu2  ;;  %v2517_v7 = vadd.f32 %v2516_v42, %v1341_v59  ;;  %v4642_v18 = vld [vmem:[%s6931_s7 + $0x5e0] sm:$0xf0]  ;;  %v2519_v20 = vadd.f32 %v2518_v2, %v1341_v59  ;;  %v2586_v26 = vpop.f32.mrf.mxu1 }
 0x25a   :  { %v2587_v37 = vadd.f32 %v2586_v26, %v2573_v5 }
 0x25b   :  { %2849 = vmatpush.bf16.msra.mxu0 %v3488_v10  ;;  %2872 = vmatpush.bf16.msra.mxu2 %v4076_v11  ;;  %v3908_v10 = vor.u32 %v4572_v6, %v3907_v3  ;;  %v4215_v11 = vld [vmem:[%s6931_s7 + $0x600] sm:$0xf]  ;;  %v2531_v13 = vadd.f32 %v2530_v48, %v2517_v7  ;;  %v2533_v25 = vadd.f32 %v2532_v8, %v2519_v20  ;;  %v1344_v3 = vperm.slane %v6860_v53, 3 }
 0x25c   :  { %v4216_v16 = vor.u32 %v4649_v12, %v4215_v11 }
 0x25d   :  { %2861 = vmatpush.bf16.msra.mxu1 %v3768_v19  ;;  %2835 = vmatpush.bf16.msrb.mxu3 %v4156_v29  ;;  %v2545_v15 = vadd.f32 %v2544_v50, %v2531_v13 }
 0x25f   :  { %2850 = vmatpush.bf16.msra.mxu0 %v3460_v22  ;;  %2873 = vmatpush.bf16.msra.mxu2 %v4048_v23  ;;  %v4188_v22 = vor.u32 %v4642_v18, %v4187_v17  ;;  %v4159_v23 = vld [vmem:[%s6931_s7 + $0x590] sm:$0xf]  ;;  %v2628_v46 = vpop.f32.mrf.mxu0 }
 0x261   :  { %2862 = vmatpush.bf16.msra.mxu1 %v3740_v30  ;;  %2836 = vmatpush.bf16.msrb.mxu3 %v4128_v62  ;;  %v2546_v14 = vpop.f32.mrf.mxu2  ;;  %v4160_v30 = vor.u32 %v4635_v24, %v4159_v23  ;;  %v2588_v39 = vpop.f32.mrf.mxu1 }
 0x262   :  { %2851 = vmatmul.bf16.vlgmr.msra.gmra.mxu0 %v5911_v40  ;;  %v4670_v40 = vld [vmem:[%s6931_s7 + $0x6c0] sm:$0xf0]  ;;  %v2547_v28 = vadd.f32 %v2546_v14, %v2533_v25 }
 0x263   :  { %2874 = vmatpush.bf16.msra.mxu2 %v4020_v34  ;;  %v4300_v52 = vor.u32 %v4670_v40, %v4299_v47  ;;  %v1343_v47 = vperm.slane %v6860_v53, 2 }
 0x264   :  { %2837 = vmatmul.bf16.vlgmr.msrb.gmra.mxu3 %v6071_v27 }
 0x265   :  { %2863 = vmatpush.bf16.msra.mxu1 %v3712_v43  ;;  %2885 = vmatpush.bf16.msra.mxu3 %v4328_v44 }
 0x267   :  { %2875 = vmatpush.bf16.msra.mxu2 %v3992_v41  ;;  %v2589_v41 = vadd.f32 %v2588_v39, %v2575_v45  ;;  %v2630_v55 = vpop.f32.mrf.mxu0 }
 0x269   :  { %2864 = vmatpush.bf16.msra.mxu1 %v3684_v51  ;;  %2886 = vmatpush.bf16.msra.mxu3 %v4300_v52  ;;  %v2600_v29 = vpop.f32.mrf.mxu2  ;;  %v2642_v48 = vpop.f32.mrf.mxu1  ;;  %v2629_v51 = vadd.f32 %v2628_v46, %v1343_v47 }
 0x26a   :  { %v2601_v62 = vadd.f32 %v2600_v29, %v2587_v37  ;;  %v1346_v37 = vperm.slane %v6860_v53, 5 }
 0x26b   :  { %2876 = vmatpush.bf16.msra.mxu2 %v3964_v54  ;;  %v2643_v52 = vadd.f32 %v2642_v48, %v2629_v51 }
 0x26c   :  { %2865 = vmatmul.bf16.vlgmr.msra.gmra.mxu1 %v5945_v4  ;;  %v2558_v4 = vpop.f32.mrf.mxu3 }
 0x26d   :  { %2887 = vmatpush.bf16.msra.mxu3 %v4272_v60  ;;  %v2559_v19 = vadd.f32 %v2558_v4, %v2545_v15 }
 0x26f   :  { %2877 = vmatpush.bf16.msra.mxu2 %v3936_v61  ;;  %2899 = vst [vmem:[#allocation2] sm:$0xff] %v2559_v19 }
 0x271   :  { %2888 = vmatpush.bf16.msra.mxu3 %v4244_v9  ;;  %v2602_v42 = vpop.f32.mrf.mxu2  ;;  %v2644_v58 = vpop.f32.mrf.mxu1 }
 0x272   :  { %v2603_v40 = vadd.f32 %v2602_v42, %v2589_v41 }
 0x273   :  { %2878 = vmatpush.bf16.msra.mxu2 %v3908_v10 }
 0x274   :  { %v2560_v32 = vpop.f32.mrf.mxu3 }
 0x275   :  { %2889 = vmatpush.bf16.msra.mxu3 %v4216_v16  ;;  %v2561_v34 = vadd.f32 %v2560_v32, %v2547_v28 }
 0x276   :  { %2879 = vmatmul.bf16.vlgmr.msra.gmra.mxu2 %v5989_v38  ;;  %v4131_v38 = vld [vmem:[%s6931_s7 + $0x558] sm:$0xf]  ;;  %s4708_s7 = smov [#allocation2]  }
 0x277   :  { %2907 = vst [vmem:[#allocation2 + $0x38] sm:$0xff] %v2561_v34  ;;  %v4132_v35 = vor.u32 %v4628_v33, %v4131_v38  ;;  %s2918_s23 = sshll.u32 %s4708_s7, 4  ;;  %s2919_s23 = int_to_ptr.vmem [resolvable:$true] %s2918_s23 }
 0x279   :  { %2890 = vmatpush.bf16.msra.mxu3 %v4188_v22  ;;  %v2656_v50 = vpop.f32.mrf.mxu2 }
 0x27a   :  { %v2657_v54 = vadd.f32 %v2656_v50, %v2643_v52 }
 0x27c   :  { %v2614_v43 = vpop.f32.mrf.mxu3 }
 0x27d   :  { %2891 = vmatpush.bf16.msra.mxu3 %v4160_v30  ;;  %v2615_v44 = vadd.f32 %v2614_v43, %v2601_v62 }
 0x27f   :  { %2900 = vst [vmem:[#allocation2 + $0x8] sm:$0xff] %v2615_v44  ;;  %v2684_v2 = vpop.f32.mrf.mxu0 }
 0x280   :  { %v2685_v8 = vadd.f32 %v2684_v2, %v1344_v3 }
 0x281   :  { %2892 = vmatpush.bf16.msra.mxu3 %v4132_v35  ;;  %v2658_v59 = vpop.f32.mrf.mxu2 }
 0x284   :  { %2893 = vmatmul.bf16.vlgmr.msra.gmra.mxu3 %v6071_v27  ;;  %v2616_v1 = vpop.f32.mrf.mxu3  ;;  %v2631_v27 = vadd.f32 %v2630_v55, %v1343_v47 }
 0x285   :  { %v2617_v49 = vadd.f32 %v2616_v1, %v2603_v40 }
 0x286   :  { %v2645_v60 = vadd.f32 %v2644_v58, %v2631_v27 }
 0x287   :  { %2908 = vst [vmem:[#allocation2 + $0x40] sm:$0xff] %v2617_v49  ;;  %v2686_v11 = vpop.f32.mrf.mxu0 }
 0x288   :  { %v2659_v61 = vadd.f32 %v2658_v59, %v2645_v60  ;;  %v2687_v15 = vadd.f32 %v2686_v11, %v1344_v3 }
 0x289   :  { %v2698_v6 = vpop.f32.mrf.mxu1 }
 0x28a   :  { %v2699_v9 = vadd.f32 %v2698_v6, %v2685_v8 }
 0x28c   :  { %v2670_v56 = vpop.f32.mrf.mxu3 }
 0x28d   :  { %v2671_v57 = vadd.f32 %v2670_v56, %v2657_v54  ;;  %v1347_v54 = vperm.slane %v6860_v53, 6 }
 0x28f   :  { %2901 = vst [vmem:[#allocation2 + $0x10] sm:$0xff] %v2671_v57 }
 0x291   :  { %v2700_v14 = vpop.f32.mrf.mxu1 }
 0x292   :  { %v2701_v4 = vadd.f32 %v2700_v14, %v2687_v15 }
 0x294   :  { %v2672_v63 = vpop.f32.mrf.mxu3 }
 0x295   :  { %v2673_v0 = vadd.f32 %v2672_v63, %v2659_v61 }
 0x297   :  { %2909 = vst [vmem:[#allocation2 + $0x48] sm:$0xff] %v2673_v0 }
 0x299   :  { %v2712_v7 = vpop.f32.mrf.mxu2 }
 0x29a   :  { %v2713_v10 = vadd.f32 %v2712_v7, %v2699_v9 }
 0x29f   :  { %v2740_v20 = vpop.f32.mrf.mxu0 }
 0x2a0   :  { %v2741_v24 = vadd.f32 %v2740_v20, %v1345_v21 }
 0x2a1   :  { %v2714_v16 = vpop.f32.mrf.mxu2 }
 0x2a2   :  { %v2715_v17 = vadd.f32 %v2714_v16, %v2701_v4 }
 0x2a7   :  { %v2726_v12 = vpop.f32.mrf.mxu3  ;;  %v2742_v28 = vpop.f32.mrf.mxu0 }
 0x2a8   :  { %v2727_v13 = vadd.f32 %v2726_v12, %v2713_v10  ;;  %v2743_v32 = vadd.f32 %v2742_v28, %v1345_v21 }
 0x2a9   :  { %v2754_v22 = vpop.f32.mrf.mxu1 }
 0x2aa   :  { %2902 = vst [vmem:[#allocation2 + $0x18] sm:$0xff] %v2727_v13  ;;  %v2755_v25 = vadd.f32 %v2754_v22, %v2741_v24 }
 0x2af   :  { %v2728_v18 = vpop.f32.mrf.mxu3 }
 0x2b0   :  { %v2729_v19 = vadd.f32 %v2728_v18, %v2715_v17 }
 0x2b1   :  { %v2756_v31 = vpop.f32.mrf.mxu1 }
 0x2b2   :  { %2910 = vst [vmem:[#allocation2 + $0x50] sm:$0xff] %v2729_v19  ;;  %v2757_v33 = vadd.f32 %v2756_v31, %v2743_v32 }
 0x2b9   :  { %v2768_v23 = vpop.f32.mrf.mxu2 }
 0x2ba   :  { %v2769_v26 = vadd.f32 %v2768_v23, %v2755_v25 }
 0x2bf   :  { %v2796_v36 = vpop.f32.mrf.mxu0 }
 0x2c0   :  { %v2797_v42 = vadd.f32 %v2796_v36, %v1346_v37 }
 0x2c1   :  { %v2770_v38 = vpop.f32.mrf.mxu2 }
 0x2c2   :  { %v2771_v34 = vadd.f32 %v2770_v38, %v2757_v33 }
 0x2c7   :  { %v2782_v29 = vpop.f32.mrf.mxu3  ;;  %v2798_v45 = vpop.f32.mrf.mxu0 }
 0x2c8   :  { %v2783_v30 = vadd.f32 %v2782_v29, %v2769_v26  ;;  %v2799_v40 = vadd.f32 %v2798_v45, %v1346_v37 }
 0x2c9   :  { %v2810_v39 = vpop.f32.mrf.mxu1 }
 0x2ca   :  { %2903 = vst [vmem:[#allocation2 + $0x20] sm:$0xff] %v2783_v30  ;;  %v2811_v43 = vadd.f32 %v2810_v39, %v2797_v42 }
 0x2cf   :  { %v2784_v35 = vpop.f32.mrf.mxu3 }
 0x2d0   :  { %v2785_v5 = vadd.f32 %v2784_v35, %v2771_v34 }
 0x2d1   :  { %v2812_v47 = vpop.f32.mrf.mxu1 }
 0x2d2   :  { %2911 = vst [vmem:[#allocation2 + $0x58] sm:$0xff] %v2785_v5  ;;  %v2813_v1 = vadd.f32 %v2812_v47, %v2799_v40 }
 0x2d9   :  { %v2824_v62 = vpop.f32.mrf.mxu2 }
 0x2da   :  { %v2825_v44 = vadd.f32 %v2824_v62, %v2811_v43 }
 0x2df   :  { %v2852_v52 = vpop.f32.mrf.mxu0 }
 0x2e0   :  { %v2853_v57 = vadd.f32 %v2852_v52, %v1347_v54 }
 0x2e1   :  { %v2826_v48 = vpop.f32.mrf.mxu2 }
 0x2e2   :  { %v2827_v49 = vadd.f32 %v2826_v48, %v2813_v1 }
 0x2e7   :  { %v2838_v41 = vpop.f32.mrf.mxu3  ;;  %v2854_v59 = vpop.f32.mrf.mxu0 }
 0x2e8   :  { %v2839_v46 = vadd.f32 %v2838_v41, %v2825_v44  ;;  %v2855_v0 = vadd.f32 %v2854_v59, %v1347_v54 }
 0x2e9   :  { %v2866_v55 = vpop.f32.mrf.mxu1 }
 0x2ea   :  { %2904 = vst [vmem:[#allocation2 + $0x28] sm:$0xff] %v2839_v46  ;;  %v2867_v58 = vadd.f32 %v2866_v55, %v2853_v57 }
 0x2ef   :  { %v2840_v50 = vpop.f32.mrf.mxu3 }
 0x2f0   :  { %v2841_v51 = vadd.f32 %v2840_v50, %v2827_v49 }
 0x2f1   :  { %v2868_v63 = vpop.f32.mrf.mxu1 }
 0x2f2   :  { %2912 = vst [vmem:[#allocation2 + $0x60] sm:$0xff] %v2841_v51  ;;  %v2869_v3 = vadd.f32 %v2868_v63, %v2855_v0 }
 0x2f9   :  { %v2880_v56 = vpop.f32.mrf.mxu2 }
 0x2fa   :  { %v2881_v27 = vadd.f32 %v2880_v56, %v2867_v58 }
 0x301   :  { %v2882_v2 = vpop.f32.mrf.mxu2 }
 0x302   :  { %v2883_v53 = vadd.f32 %v2882_v2, %v2869_v3 }
 0x307   :  { %v2894_v60 = vpop.f32.mrf.mxu3 }
 0x308   :  { %v2895_v61 = vadd.f32 %v2894_v60, %v2881_v27 }
 0x30a   :  { %2906 = vst.msk [vmem:[#allocation2 + $0x30] sm:$0xff] %vm2905_vm1, %v2895_v61 }
 0x30f   :  { %v2896_v6 = vpop.f32.mrf.mxu3 }
 0x310   :  { %v2897_v7 = vadd.f32 %v2896_v6, %v2883_v53 }
 0x312   :  { %2913 = vst.msk [vmem:[#allocation2 + $0x68] sm:$0xff] %vm2905_vm1, %v2897_v7 }
 0x313   :  { %2926 = dma.vmem_to_hbm [thread:$0]  %s2919_s23, 1792, %s2921_s26, [#allocation3], %s4709_s2, %s4709_s2, %s4710_s8  }
 0x314   :  { %4706 = dma.done.wait [#allocation3], 1792  }
 0x315   :  { %4707 = vsyncadd [#allocation3], 4294965504 }
 0x316   :  { %2931 = vsyncpa [#allocation3], 1 }

</bundles_post_ra>
